<compile_context>
chip_gen: v6e
topology: v6e:2x2x1
jax: 0.10.0
libtpu: 0.0.40
codegen_flags: <defaults>
</compile_context>

<pallas_src>
import functools

import jax
import jax.numpy as jnp
import numpy as np
from jax.experimental import pallas as pl
from jax.experimental.pallas import tpu as pltpu

# ---- model hyperparameters (small, consistent with MFN.__init__) ----
D_L, D_A, D_V = 8, 8, 8
DH_L, DH_A, DH_V = 8, 8, 8
MEM_DIM = 16
WINDOW = 2                      # cStar = cat(prev_cs, new_cs)
H_ATT1, H_ATT2 = 16, 16
H_G1, H_G2 = 16, 16
H_OUT = 16
D_FUSION = 16
BETA = 1.0
M_MOD = 3

TOTAL_H = DH_L + DH_A + DH_V                  # 24
ATT_IN = TOTAL_H * WINDOW                     # 48
GAMMA_IN = ATT_IN + MEM_DIM                   # 64
FINAL_OUT = D_FUSION + MEM_DIM                # 32
AG_HID = H_G1 + H_G2 + H_ATT2                 # 48  (fused gamma1|gamma2|c_hat hidden)
AG_OUT = 3 * MEM_DIM                          # 48  (gamma1|gamma2|c_hat)

T, N = 6, 4
D_TOT = D_L + D_A + D_V                       # 24

NUM_PARAMS = 35
# Note: all dropouts in the module have p=0 -> identity at inference; omitted.

# --------------------------- packed parameter slab ---------------------------
SLAB_COLS = 128                                # lane-aligned width


def _round8(n):
    return (n + 7) // 8 * 8


# (name, (rows, cols)) of each FUSED parameter placed in the slab.
_LAYOUT_ENTRIES = [
    ("wih",    (D_TOT, 4 * TOTAL_H)),          # block-diag fused LSTM W_ih^T
    ("whh",    (TOTAL_H, 4 * TOTAL_H)),        # block-diag fused LSTM W_hh^T
    ("b_lstm", (1, 4 * TOTAL_H)),
    ("a1w1",   (ATT_IN, H_ATT1)), ("a1b1", (1, H_ATT1)),
    ("a1w2",   (H_ATT1, ATT_IN)), ("a1b2", (1, ATT_IN)),
    # fused gamma1 / gamma2 / c_hat (att2) MLP
    ("agw1",   (GAMMA_IN, AG_HID)), ("agb1", (1, AG_HID)),
    ("agw2",   (AG_HID, AG_OUT)),   ("agb2", (1, AG_OUT)),
    ("fw",     (TOTAL_H, 3 * D_FUSION)), ("fb", (1, 3 * D_FUSION)),
    ("o1w",    (FINAL_OUT, H_OUT)), ("o1b", (1, H_OUT)),
    ("o2w",    (H_OUT, 1)), ("o2b", (1, 1)),
]

_LAYOUT = {}
_r = 0
for _name, (_rows, _cols) in _LAYOUT_ENTRIES:
    _LAYOUT[_name] = (_r, _rows, _cols)
    _r += _round8(_rows)                       # keep every block sublane-aligned
SLAB_ROWS = _round8(_r)


# ------------------------------- Pallas kernel -------------------------------
def _k_sigmoid(x):
    # sigmoid via tanh: stays on the EUP, no divide on the VPU path.
    return 0.5 * (jnp.tanh(0.5 * x) + 1.0)


def _k_relu(x):
    return jnp.maximum(x, 0.0)


def _k_softmax_rows(x):
    m = jnp.max(x, axis=1, keepdims=True)
    ex = jnp.exp(x - m)
    return ex * pl.reciprocal(jnp.sum(ex, axis=1, keepdims=True), approx=True)


def mfn_kernel(x2d_ref, p_ref, out_ref, *, t_steps, n_pad, n_real):
    def dot(a, b):
        return jnp.dot(a, b, preferred_element_type=jnp.float32)

    def p(name, full_lanes=False):
        r, rows, cols = _LAYOUT[name]
        # full_lanes: trailing slab lanes are zero and the consumer never reads
        # the corresponding output lanes -> keep the operand a full 128-lane
        # vreg (unmasked loads / adds / EUP passes).
        if full_lanes:
            return p_ref[r:r + rows, :]
        return p_ref[r:r + rows, :cols]

    # Hoisted, loop-invariant parameter loads (one slab, static slices).
    wih = p("wih", True)
    whh = p("whh", True)
    b_lstm = p("b_lstm", True)
    a1w1, a1b1, a1w2, a1b2 = p("a1w1"), p("a1b1"), p("a1w2"), p("a1b2")
    agw1, agb1 = p("agw1"), p("agb1")
    agw2, agb2 = p("agw2", True), p("agb2", True)
    fw, fb = p("fw", True), p("fb", True)
    o1w, o1b, o2w, o2b = p("o1w"), p("o1b"), p("o2w"), p("o2b")

    # Hoisted input projection: ONE (T*n_pad, 24)@(24, 128) matmul + bias,
    # removed from the serial per-step chain.  Lanes 96:128 are zero.
    gx = dot(x2d_ref[...], wih) + b_lstm                 # (T*n_pad, 128)

    # packed recurrent state: h/c are [l | a | v] along features
    h = jnp.zeros((n_pad, TOTAL_H), jnp.float32)
    c = jnp.zeros((n_pad, TOTAL_H), jnp.float32)
    mem = jnp.zeros((n_pad, MEM_DIM), jnp.float32)

    # Fully-unrolled time recurrence (T static & small) — no grid-step overhead.
    for t in range(t_steps):
        # fused 3-modality LSTM: gate layout [i(24) | f(24) | g(24) | o(24)]
        gates = dot(h, whh) + gx[t * n_pad:(t + 1) * n_pad, :]   # (n_pad, 128)
        # full-vreg EUP passes, then cheap lane slices
        sg = _k_sigmoid(gates)
        tg = jnp.tanh(gates)
        i_g = sg[:, 0 * TOTAL_H:1 * TOTAL_H]
        f_g = sg[:, 1 * TOTAL_H:2 * TOTAL_H]
        g_g = tg[:, 2 * TOTAL_H:3 * TOTAL_H]
        o_g = sg[:, 3 * TOTAL_H:4 * TOTAL_H]
        c_new = f_g * c + i_g * g_g
        h = o_g * jnp.tanh(c_new)

        # cStar = [prev_cs | new_cs] — packed state makes this a single concat
        c_star = jnp.concatenate([c, c_new], axis=1)     # (n_pad, 48)
        logits = dot(_k_relu(dot(c_star, a1w1) + a1b1), a1w2) + a1b2
        att = _k_softmax_rows(logits)
        attended = att * c_star

        # fused gamma1/gamma2/c_hat MLP:
        #   layer 1: (n_pad,64)@(64,48); layer 2 block-diag: (n_pad,48)@(48,48)
        #   output lanes: [gamma1 0:16 | gamma2 16:32 | c_hat 32:48]
        both = jnp.concatenate([attended, mem], axis=1)  # (n_pad, 64)
        z = _k_relu(dot(both, agw1) + agb1)              # (n_pad, 48)
        o2 = dot(z, agw2) + agb2                         # (n_pad, 128)
        so = _k_sigmoid(o2)                              # full-vreg EUP pass
        to = jnp.tanh(o2)                                # full-vreg EUP pass
        g1 = so[:, 0:MEM_DIM]                            # aligned with mem lanes
        g2 = so[:, MEM_DIM:2 * MEM_DIM]
        c_hat = to[:, 2 * MEM_DIM:3 * MEM_DIM]
        mem = g1 * mem + g2 * c_hat
        c = c_new

    # ---- output head ----
    hf = dot(h, fw) + fb                                 # (n_pad, 128), lanes 48: = 0

    # torch.max(logits) is a GLOBAL max over the real batch rows; exclude the
    # padded rows from the reduction (they carry bias-driven values).
    if n_real < n_pad:
        row_ids = jax.lax.broadcasted_iota(jnp.int32, hf.shape, 0)
        hf_m = jnp.where(row_ids < n_real, hf, -jnp.inf)
    else:
        hf_m = hf
    m_l = jnp.max(hf_m[:, 0 * D_FUSION:1 * D_FUSION])
    m_a = jnp.max(hf_m[:, 1 * D_FUSION:2 * D_FUSION])
    m_v = jnp.max(hf_m[:, 2 * D_FUSION:3 * D_FUSION])

    off = jnp.concatenate(
        [hf[:, 0 * D_FUSION:1 * D_FUSION] - m_l,
         hf[:, 1 * D_FUSION:2 * D_FUSION] - m_a,
         hf[:, 2 * D_FUSION:3 * D_FUSION] - m_v], axis=1)   # (n_pad, 48)

    e = BETA / (M_MOD - 1)
    term = jnp.exp(e * off) * off                        # p**e * log(p), one EUP pass
    lav = (term[:, 0 * D_FUSION:1 * D_FUSION]
           + term[:, 1 * D_FUSION:2 * D_FUSION]
           + term[:, 2 * D_FUSION:3 * D_FUSION])

    last_hs = jnp.concatenate([lav, mem], axis=1)        # (n_pad, FINAL_OUT)
    out = dot(_k_relu(dot(last_hs, o1w) + o1b), o2w) + o2b
    out_ref[...] = out


def mfn_pallas(x, slab):
    t, n, d = x.shape
    n_pad = _round8(n)                                   # f32 sublane alignment
    if n_pad != n:
        x = jnp.pad(x, ((0, 0), (0, n_pad - n), (0, 0)))
    x2d = x.reshape(t * n_pad, d)                        # wrapper-side reshape/pad

    kernel = functools.partial(mfn_kernel, t_steps=t, n_pad=n_pad, n_real=n)
    out = pl.pallas_call(
        kernel,
        out_shape=jax.ShapeDtypeStruct((n_pad, 1), jnp.float32),
        # gridless call: whole (tiny) operands resident in VMEM, single DMA each
        in_specs=[pl.BlockSpec(memory_space=pltpu.MemorySpace.VMEM),
                  pl.BlockSpec(memory_space=pltpu.MemorySpace.VMEM)],
        out_specs=pl.BlockSpec(memory_space=pltpu.MemorySpace.VMEM),
    )(x2d, slab)
    return out.reshape(-1)[:n]                           # matches torch .flatten()


# ----------------------- wrapper: fuse & pack the params ----------------------
def pack_params(params):
    assert len(params) == NUM_PARAMS
    (wih_l, whh_l, bl, wih_a, whh_a, ba, wih_v, whh_v, bv,
     a1w1, a1b1, a1w2, a1b2, a2w1, a2b1, a2w2, a2b2,
     g1w1, g1b1, g1w2, g1b2, g2w1, g2b1, g2w2, g2b2,
     flw, flb, faw, fab, fvw, fvb, o1w, o1b, o2w, o2b) = [np.asarray(p) for p in params]

    # fused 3-way LSTM weights, gate layout [i_l i_a i_v | f.. | g.. | o..]
    wih_f = np.zeros((D_TOT, 4 * TOTAL_H), np.float32)
    whh_f = np.zeros((TOTAL_H, 4 * TOTAL_H), np.float32)
    b_f = np.zeros((1, 4 * TOTAL_H), np.float32)
    mods = [(wih_l, whh_l, bl, D_L, DH_L),
            (wih_a, whh_a, ba, D_A, DH_A),
            (wih_v, whh_v, bv, D_V, DH_V)]
    x_off = h_off = 0
    for wi, wh, b, din, dh in mods:
        for k in range(4):                               # i, f, g, o (PyTorch order)
            col = k * TOTAL_H + h_off
            wih_f[x_off:x_off + din, col:col + dh] = wi[:, k * dh:(k + 1) * dh]
            whh_f[h_off:h_off + dh, col:col + dh] = wh[:, k * dh:(k + 1) * dh]
            b_f[0, col:col + dh] = b[0, k * dh:(k + 1) * dh]
        x_off += din
        h_off += dh

    # fused gamma1 / gamma2 / c_hat (att2) MLP.
    # layer 1 input is `both` = [attended(48) | mem(16)]; a2 only sees attended,
    # so its rows over mem are zero.  Hidden layout: [g1(16) | g2(16) | a2(16)].
    agw1_f = np.zeros((GAMMA_IN, AG_HID), np.float32)
    agw1_f[:, 0:H_G1] = g1w1
    agw1_f[:, H_G1:H_G1 + H_G2] = g2w1
    agw1_f[:ATT_IN, H_G1 + H_G2:] = a2w1
    agb1_f = np.concatenate([g1b1, g2b1, a2b1], axis=1)
    # layer 2 block-diagonal; output layout: [gamma1(0:16) | gamma2(16:32) | c_hat(32:48)]
    agw2_f = np.zeros((AG_HID, AG_OUT), np.float32)
    agw2_f[0:H_G1, 0:MEM_DIM] = g1w2
    agw2_f[H_G1:H_G1 + H_G2, MEM_DIM:2 * MEM_DIM] = g2w2
    agw2_f[H_G1 + H_G2:, 2 * MEM_DIM:] = a2w2
    agb2_f = np.concatenate([g1b2, g2b2, a2b2], axis=1)

    # fused fusion_l/a/v as block-diagonal (24, 48)
    fw_f = np.zeros((TOTAL_H, 3 * D_FUSION), np.float32)
    fw_f[0:DH_L, 0:D_FUSION] = flw
    fw_f[DH_L:DH_L + DH_A, D_FUSION:2 * D_FUSION] = faw
    fw_f[DH_L + DH_A:, 2 * D_FUSION:] = fvw
    fb_f = np.concatenate([flb, fab, fvb], axis=1)

    fused = {
        "wih": wih_f, "whh": whh_f, "b_lstm": b_f,
        "a1w1": a1w1, "a1b1": a1b1, "a1w2": a1w2, "a1b2": a1b2,
        "agw1": agw1_f, "agb1": agb1_f, "agw2": agw2_f, "agb2": agb2_f,
        "fw": fw_f, "fb": fb_f,
        "o1w": o1w, "o1b": o1b, "o2w": o2w, "o2b": o2b,
    }

    slab = np.zeros((SLAB_ROWS, SLAB_COLS), np.float32)
    for name, (r, rows, cols) in _LAYOUT.items():
        arr = fused[name]
        assert arr.shape == (rows, cols), (name, arr.shape, (rows, cols))
        slab[r:r + rows, :cols] = arr
    return jnp.asarray(slab)


# ------------------- pure-JAX UNFUSED reference (torch math) ------------------
def _linear(x, w, b):
    return jnp.dot(x, w, preferred_element_type=jnp.float32) + b


def _sigmoid(x):
    return 1.0 / (1.0 + jnp.exp(-x))


def _relu(x):
    return jnp.maximum(x, 0.0)


def _softmax_rows(x):
    m = jnp.max(x, axis=1, keepdims=True)
    ex = jnp.exp(x - m)
    return ex / jnp.sum(ex, axis=1, keepdims=True)


def _lstm_cell(x, h, c, wih, whh, b, hd):
    gates = (jnp.dot(x, wih, preferred_element_type=jnp.float32)
             + jnp.dot(h, whh, preferred_element_type=jnp.float32) + b)
    i = _sigmoid(gates[:, 0 * hd:1 * hd])
    f = _sigmoid(gates[:, 1 * hd:2 * hd])
    g = jnp.tanh(gates[:, 2 * hd:3 * hd])
    o = _sigmoid(gates[:, 3 * hd:4 * hd])
    c_new = f * c + i * g
    h_new = o * jnp.tanh(c_new)
    return h_new, c_new


def _mfn_recurrent_step(xt, h_l, h_a, h_v, c_l, c_a, c_v, mem, params):
    (wih_l, whh_l, bl, wih_a, whh_a, ba, wih_v, whh_v, bv,
     a1w1, a1b1, a1w2, a1b2, a2w1, a2b1, a2w2, a2b2,
     g1w1, g1b1, g1w2, g1b2, g2w1, g2b1, g2w2, g2b2) = params[:25]

    xl = xt[:, :D_L]
    xa = xt[:, D_L:D_L + D_A]
    xv = xt[:, D_L + D_A:]

    nhl, ncl = _lstm_cell(xl, h_l, c_l, wih_l, whh_l, bl, DH_L)
    nha, nca = _lstm_cell(xa, h_a, c_a, wih_a, whh_a, ba, DH_A)
    nhv, ncv = _lstm_cell(xv, h_v, c_v, wih_v, whh_v, bv, DH_V)

    prev_cs = jnp.concatenate([c_l, c_a, c_v], axis=1)
    new_cs = jnp.concatenate([ncl, nca, ncv], axis=1)
    c_star = jnp.concatenate([prev_cs, new_cs], axis=1)

    att = _softmax_rows(_linear(_relu(_linear(c_star, a1w1, a1b1)), a1w2, a1b2))
    attended = att * c_star
    c_hat = jnp.tanh(_linear(_relu(_linear(attended, a2w1, a2b1)), a2w2, a2b2))

    both = jnp.concatenate([attended, mem], axis=1)
    g1 = _sigmoid(_linear(_relu(_linear(both, g1w1, g1b1)), g1w2, g1b2))
    g2 = _sigmoid(_linear(_relu(_linear(both, g2w1, g2b1)), g2w2, g2b2))
    new_mem = g1 * mem + g2 * c_hat
    return nhl, nha, nhv, ncl, nca, ncv, new_mem


def _mfn_head(h_l, h_a, h_v, mem, params):
    (flw, flb, faw, fab, fvw, fvb, o1w, o1b, o2w, o2b) = params[25:]

    hf_l = _linear(h_l, flw, flb)
    hf_a = _linear(h_a, faw, fab)
    hf_v = _linear(h_v, fvw, fvb)

    def compute_exp(logits):
        return jnp.exp(logits - jnp.max(logits))   # global max, as torch.max(logits)

    p_l, p_a, p_v = compute_exp(hf_l), compute_exp(hf_a), compute_exp(hf_v)
    e = BETA / (M_MOD - 1)

    def powe(p):
        return jnp.exp(e * jnp.log(p))

    lav = (powe(p_l) * jnp.log(p_l) + powe(p_a) * jnp.log(p_a)
           + powe(p_v) * jnp.log(p_v))

    last_hs = jnp.concatenate([lav, mem], axis=1)
    return _linear(_relu(_linear(last_hs, o1w, o1b)), o2w, o2b)


def mfn_reference(x, params):
    t, n, _ = x.shape
    h_l = jnp.zeros((n, DH_L), jnp.float32)
    h_a = jnp.zeros((n, DH_A), jnp.float32)
    h_v = jnp.zeros((n, DH_V), jnp.float32)
    c_l = jnp.zeros((n, DH_L), jnp.float32)
    c_a = jnp.zeros((n, DH_A), jnp.float32)
    c_v = jnp.zeros((n, DH_V), jnp.float32)
    mem = jnp.zeros((n, MEM_DIM), jnp.float32)
    for i in range(t):
        h_l, h_a, h_v, c_l, c_a, c_v, mem = _mfn_recurrent_step(
            x[i], h_l, h_a, h_v, c_l, c_a, c_v, mem, params)
    return _mfn_head(h_l, h_a, h_v, mem, params).reshape(-1)


# ------------------------------ parameter init --------------------------------
def init_params(key):
    shapes = [
        # LSTM cells: W_ih^T, W_hh^T, (b_ih + b_hh)
        (D_L, 4 * DH_L), (DH_L, 4 * DH_L), (1, 4 * DH_L),
        (D_A, 4 * DH_A), (DH_A, 4 * DH_A), (1, 4 * DH_A),
        (D_V, 4 * DH_V), (DH_V, 4 * DH_V), (1, 4 * DH_V),
        # att1
        (ATT_IN, H_ATT1), (1, H_ATT1), (H_ATT1, ATT_IN), (1, ATT_IN),
        # att2
        (ATT_IN, H_ATT2), (1, H_ATT2), (H_ATT2, MEM_DIM), (1, MEM_DIM),
        # gamma1
        (GAMMA_IN, H_G1), (1, H_G1), (H_G1, MEM_DIM), (1, MEM_DIM),
        # gamma2
        (GAMMA_IN, H_G2), (1, H_G2), (H_G2, MEM_DIM), (1, MEM_DIM),
        # fusion_l / fusion_a / fusion_v
        (DH_L, D_FUSION), (1, D_FUSION),
        (DH_A, D_FUSION), (1, D_FUSION),
        (DH_V, D_FUSION), (1, D_FUSION),
        # out head
        (FINAL_OUT, H_OUT), (1, H_OUT),
        (H_OUT, 1), (1, 1),
    ]
    assert len(shapes) == NUM_PARAMS
    keys = jax.random.split(key, len(shapes))
    return tuple(0.1 * jax.random.normal(k, s, dtype=jnp.float32)
                 for k, s in zip(keys, shapes))


if __name__ == "__main__":
    key = jax.random.PRNGKey(0)
    kx, kp = jax.random.split(key)
    x = jax.random.normal(kx, (T, N, D_TOT), dtype=jnp.float32)
    params = init_params(kp)
    slab = pack_params(params)

    out = jax.block_until_ready(jax.jit(mfn_pallas)(x, slab))
    ref = jax.block_until_ready(mfn_reference(x, params))

    assert out.shape == (N,), out.shape
    # Tolerance accounts for default-precision MXU matmuls (bf16-grade mantissa
    # compounding over T=6 recurrent steps) + the EUP approx reciprocal in the
    # kernel softmax (both sub-1e-3 effects here).
    if not np.allclose(np.asarray(out), np.asarray(ref), atol=2e-3, rtol=2e-3):
        raise AssertionError(f"Pallas/reference mismatch:\n{out}\n{ref}")
    print("KERNEL_OK")
</pallas_src>

<mosaic_0001>
module attributes {stable_mosaic.version = 11 : i64} {
  func.func @mfn_kernel(%arg0: memref<48x24xf32, #tpu.memory_space<vmem>>, %arg1: memref<360x128xf32, #tpu.memory_space<vmem>>, %arg2: memref<8x1xf32, #tpu.memory_space<vmem>>) attributes {dimension_semantics = [], scalar_prefetch = 0 : i64, scratch_operands = 0 : i64, tpu.core_type = #tpu.core_type<tc>} {
    %c0 = arith.constant 0 : index
    %c0_0 = arith.constant 0 : index
    %0 = vector.load %arg1[%c0, %c0_0] : memref<360x128xf32, #tpu.memory_space<vmem>>, vector<24x128xf32>
    %c24 = arith.constant 24 : index
    %c0_1 = arith.constant 0 : index
    %1 = vector.load %arg1[%c24, %c0_1] : memref<360x128xf32, #tpu.memory_space<vmem>>, vector<24x128xf32>
    %c48 = arith.constant 48 : index
    %c0_2 = arith.constant 0 : index
    %2 = vector.load %arg1[%c48, %c0_2] : memref<360x128xf32, #tpu.memory_space<vmem>>, vector<1x128xf32>
    %c56 = arith.constant 56 : index
    %c0_3 = arith.constant 0 : index
    %3 = vector.load %arg1[%c56, %c0_3] : memref<360x128xf32, #tpu.memory_space<vmem>>, vector<48x16xf32>
    %c104 = arith.constant 104 : index
    %c0_4 = arith.constant 0 : index
    %4 = vector.load %arg1[%c104, %c0_4] : memref<360x128xf32, #tpu.memory_space<vmem>>, vector<1x16xf32>
    %c112 = arith.constant 112 : index
    %c0_5 = arith.constant 0 : index
    %5 = vector.load %arg1[%c112, %c0_5] : memref<360x128xf32, #tpu.memory_space<vmem>>, vector<16x48xf32>
    %c128 = arith.constant 128 : index
    %c0_6 = arith.constant 0 : index
    %6 = vector.load %arg1[%c128, %c0_6] : memref<360x128xf32, #tpu.memory_space<vmem>>, vector<1x48xf32>
    %c136 = arith.constant 136 : index
    %c0_7 = arith.constant 0 : index
    %7 = vector.load %arg1[%c136, %c0_7] : memref<360x128xf32, #tpu.memory_space<vmem>>, vector<64x48xf32>
    %c200 = arith.constant 200 : index
    %c0_8 = arith.constant 0 : index
    %8 = vector.load %arg1[%c200, %c0_8] : memref<360x128xf32, #tpu.memory_space<vmem>>, vector<1x48xf32>
    %c208 = arith.constant 208 : index
    %c0_9 = arith.constant 0 : index
    %9 = vector.load %arg1[%c208, %c0_9] : memref<360x128xf32, #tpu.memory_space<vmem>>, vector<48x128xf32>
    %c256 = arith.constant 256 : index
    %c0_10 = arith.constant 0 : index
    %10 = vector.load %arg1[%c256, %c0_10] : memref<360x128xf32, #tpu.memory_space<vmem>>, vector<1x128xf32>
    %c264 = arith.constant 264 : index
    %c0_11 = arith.constant 0 : index
    %11 = vector.load %arg1[%c264, %c0_11] : memref<360x128xf32, #tpu.memory_space<vmem>>, vector<24x128xf32>
    %c288 = arith.constant 288 : index
    %c0_12 = arith.constant 0 : index
    %12 = vector.load %arg1[%c288, %c0_12] : memref<360x128xf32, #tpu.memory_space<vmem>>, vector<1x128xf32>
    %c296 = arith.constant 296 : index
    %c0_13 = arith.constant 0 : index
    %13 = vector.load %arg1[%c296, %c0_13] : memref<360x128xf32, #tpu.memory_space<vmem>>, vector<32x16xf32>
    %c328 = arith.constant 328 : index
    %c0_14 = arith.constant 0 : index
    %14 = vector.load %arg1[%c328, %c0_14] : memref<360x128xf32, #tpu.memory_space<vmem>>, vector<1x16xf32>
    %c336 = arith.constant 336 : index
    %c0_15 = arith.constant 0 : index
    %15 = vector.load %arg1[%c336, %c0_15] : memref<360x128xf32, #tpu.memory_space<vmem>>, vector<16x1xf32>
    %c352 = arith.constant 352 : index
    %c0_16 = arith.constant 0 : index
    %16 = vector.load %arg1[%c352, %c0_16] : memref<360x128xf32, #tpu.memory_space<vmem>>, vector<1x1xf32>
    %c0_17 = arith.constant 0 : index
    %c0_18 = arith.constant 0 : index
    %17 = vector.load %arg0[%c0_17, %c0_18] : memref<48x24xf32, #tpu.memory_space<vmem>>, vector<48x24xf32>
    %cst = arith.constant dense<0.000000e+00> : vector<48x128xf32>
    %18 = tpu.matmul %17, %0, %cst {dimension_numbers = #tpu.dot_dimension_numbers<[1], [0], [0], [1], [0, 0, 1, 1], [], []>} : vector<48x24xf32>, vector<24x128xf32>, vector<48x128xf32> -> vector<48x128xf32>
    %19 = vector.broadcast %2 : vector<1x128xf32> to vector<48x128xf32>
    %20 = arith.addf %18, %19 : vector<48x128xf32>
    %cst_19 = arith.constant 0.000000e+00 : f32
    %21 = vector.broadcast %cst_19 : f32 to vector<8x24xf32>
    %cst_20 = arith.constant 0.000000e+00 : f32
    %22 = vector.broadcast %cst_20 : f32 to vector<8x24xf32>
    %cst_21 = arith.constant 0.000000e+00 : f32
    %23 = vector.broadcast %cst_21 : f32 to vector<8x16xf32>
    %cst_22 = arith.constant dense<0.000000e+00> : vector<8x128xf32>
    %24 = tpu.matmul %21, %1, %cst_22 {dimension_numbers = #tpu.dot_dimension_numbers<[1], [0], [0], [1], [0, 0, 1, 1], [], []>} : vector<8x24xf32>, vector<24x128xf32>, vector<8x128xf32> -> vector<8x128xf32>
    %25 = vector.extract_strided_slice %20 {offsets = [0, 0], sizes = [8, 128], strides = [1, 1]} : vector<48x128xf32> to vector<8x128xf32>
    %26 = arith.addf %24, %25 : vector<8x128xf32>
    %cst_23 = arith.constant 5.000000e-01 : f32
    %27 = vector.broadcast %cst_23 : f32 to vector<8x128xf32>
    %28 = arith.mulf %27, %26 : vector<8x128xf32>
    %29 = math.tanh %28 : vector<8x128xf32>
    %cst_24 = arith.constant 1.000000e+00 : f32
    %30 = vector.broadcast %cst_24 : f32 to vector<8x128xf32>
    %31 = arith.addf %29, %30 : vector<8x128xf32>
    %cst_25 = arith.constant 5.000000e-01 : f32
    %32 = vector.broadcast %cst_25 : f32 to vector<8x128xf32>
    %33 = arith.mulf %32, %31 : vector<8x128xf32>
    %34 = math.tanh %26 : vector<8x128xf32>
    %35 = vector.extract_strided_slice %33 {offsets = [0, 0], sizes = [8, 24], strides = [1, 1]} : vector<8x128xf32> to vector<8x24xf32>
    %36 = vector.extract_strided_slice %33 {offsets = [0, 24], sizes = [8, 24], strides = [1, 1]} : vector<8x128xf32> to vector<8x24xf32>
    %37 = vector.extract_strided_slice %34 {offsets = [0, 48], sizes = [8, 24], strides = [1, 1]} : vector<8x128xf32> to vector<8x24xf32>
    %38 = vector.extract_strided_slice %33 {offsets = [0, 72], sizes = [8, 24], strides = [1, 1]} : vector<8x128xf32> to vector<8x24xf32>
    %39 = arith.mulf %36, %22 : vector<8x24xf32>
    %40 = arith.mulf %35, %37 : vector<8x24xf32>
    %41 = arith.addf %39, %40 : vector<8x24xf32>
    %42 = math.tanh %41 : vector<8x24xf32>
    %43 = arith.mulf %38, %42 : vector<8x24xf32>
    %44 = tpu.concatenate %22, %41 in 1 : vector<8x24xf32>, vector<8x24xf32> -> vector<8x48xf32>
    %cst_26 = arith.constant dense<0.000000e+00> : vector<8x16xf32>
    %45 = tpu.matmul %44, %3, %cst_26 {dimension_numbers = #tpu.dot_dimension_numbers<[1], [0], [0], [1], [0, 0, 1, 1], [], []>} : vector<8x48xf32>, vector<48x16xf32>, vector<8x16xf32> -> vector<8x16xf32>
    %46 = vector.broadcast %4 : vector<1x16xf32> to vector<8x16xf32>
    %47 = arith.addf %45, %46 : vector<8x16xf32>
    %cst_27 = arith.constant 0.000000e+00 : f32
    %48 = vector.broadcast %cst_27 : f32 to vector<8x16xf32>
    %49 = arith.maximumf %47, %48 : vector<8x16xf32>
    %cst_28 = arith.constant dense<0.000000e+00> : vector<8x48xf32>
    %50 = tpu.matmul %49, %5, %cst_28 {dimension_numbers = #tpu.dot_dimension_numbers<[1], [0], [0], [1], [0, 0, 1, 1], [], []>} : vector<8x16xf32>, vector<16x48xf32>, vector<8x48xf32> -> vector<8x48xf32>
    %51 = vector.broadcast %6 : vector<1x48xf32> to vector<8x48xf32>
    %52 = arith.addf %50, %51 : vector<8x48xf32>
    %cst_29 = arith.constant dense<0xFF800000> : vector<8xf32>
    %53 = vector.multi_reduction <maximumf>, %52, %cst_29 [1] : vector<8x48xf32> to vector<8xf32>
    %54 = vector.shape_cast %53 : vector<8xf32> to vector<8x1xf32>
    %55 = vector.broadcast %54 : vector<8x1xf32> to vector<8x48xf32>
    %56 = arith.subf %52, %55 : vector<8x48xf32>
    %57 = math.exp %56 : vector<8x48xf32>
    %cst_30 = arith.constant dense<0.000000e+00> : vector<8xf32>
    %58 = vector.multi_reduction <add>, %57, %cst_30 [1] : vector<8x48xf32> to vector<8xf32>
    %59 = vector.shape_cast %58 : vector<8xf32> to vector<8x1xf32>
    %60 = tpu.reciprocal %59 {approx = true} : vector<8x1xf32> -> vector<8x1xf32>
    %61 = vector.broadcast %60 : vector<8x1xf32> to vector<8x48xf32>
    %62 = arith.mulf %57, %61 : vector<8x48xf32>
    %63 = arith.mulf %62, %44 : vector<8x48xf32>
    %64 = tpu.concatenate %63, %23 in 1 : vector<8x48xf32>, vector<8x16xf32> -> vector<8x64xf32>
    %cst_31 = arith.constant dense<0.000000e+00> : vector<8x48xf32>
    %65 = tpu.matmul %64, %7, %cst_31 {dimension_numbers = #tpu.dot_dimension_numbers<[1], [0], [0], [1], [0, 0, 1, 1], [], []>} : vector<8x64xf32>, vector<64x48xf32>, vector<8x48xf32> -> vector<8x48xf32>
    %66 = vector.broadcast %8 : vector<1x48xf32> to vector<8x48xf32>
    %67 = arith.addf %65, %66 : vector<8x48xf32>
    %cst_32 = arith.constant 0.000000e+00 : f32
    %68 = vector.broadcast %cst_32 : f32 to vector<8x48xf32>
    %69 = arith.maximumf %67, %68 : vector<8x48xf32>
    %cst_33 = arith.constant dense<0.000000e+00> : vector<8x128xf32>
    %70 = tpu.matmul %69, %9, %cst_33 {dimension_numbers = #tpu.dot_dimension_numbers<[1], [0], [0], [1], [0, 0, 1, 1], [], []>} : vector<8x48xf32>, vector<48x128xf32>, vector<8x128xf32> -> vector<8x128xf32>
    %71 = vector.broadcast %10 : vector<1x128xf32> to vector<8x128xf32>
    %72 = arith.addf %70, %71 : vector<8x128xf32>
    %cst_34 = arith.constant 5.000000e-01 : f32
    %73 = vector.broadcast %cst_34 : f32 to vector<8x128xf32>
    %74 = arith.mulf %73, %72 : vector<8x128xf32>
    %75 = math.tanh %74 : vector<8x128xf32>
    %cst_35 = arith.constant 1.000000e+00 : f32
    %76 = vector.broadcast %cst_35 : f32 to vector<8x128xf32>
    %77 = arith.addf %75, %76 : vector<8x128xf32>
    %cst_36 = arith.constant 5.000000e-01 : f32
    %78 = vector.broadcast %cst_36 : f32 to vector<8x128xf32>
    %79 = arith.mulf %78, %77 : vector<8x128xf32>
    %80 = math.tanh %72 : vector<8x128xf32>
    %81 = vector.extract_strided_slice %79 {offsets = [0, 0], sizes = [8, 16], strides = [1, 1]} : vector<8x128xf32> to vector<8x16xf32>
    %82 = vector.extract_strided_slice %79 {offsets = [0, 16], sizes = [8, 16], strides = [1, 1]} : vector<8x128xf32> to vector<8x16xf32>
    %83 = vector.extract_strided_slice %80 {offsets = [0, 32], sizes = [8, 16], strides = [1, 1]} : vector<8x128xf32> to vector<8x16xf32>
    %84 = arith.mulf %81, %23 : vector<8x16xf32>
    %85 = arith.mulf %82, %83 : vector<8x16xf32>
    %86 = arith.addf %84, %85 : vector<8x16xf32>
    %cst_37 = arith.constant dense<0.000000e+00> : vector<8x128xf32>
    %87 = tpu.matmul %43, %1, %cst_37 {dimension_numbers = #tpu.dot_dimension_numbers<[1], [0], [0], [1], [0, 0, 1, 1], [], []>} : vector<8x24xf32>, vector<24x128xf32>, vector<8x128xf32> -> vector<8x128xf32>
    %88 = vector.extract_strided_slice %20 {offsets = [8, 0], sizes = [8, 128], strides = [1, 1]} : vector<48x128xf32> to vector<8x128xf32>
    %89 = arith.addf %87, %88 : vector<8x128xf32>
    %cst_38 = arith.constant 5.000000e-01 : f32
    %90 = vector.broadcast %cst_38 : f32 to vector<8x128xf32>
    %91 = arith.mulf %90, %89 : vector<8x128xf32>
    %92 = math.tanh %91 : vector<8x128xf32>
    %cst_39 = arith.constant 1.000000e+00 : f32
    %93 = vector.broadcast %cst_39 : f32 to vector<8x128xf32>
    %94 = arith.addf %92, %93 : vector<8x128xf32>
    %cst_40 = arith.constant 5.000000e-01 : f32
    %95 = vector.broadcast %cst_40 : f32 to vector<8x128xf32>
    %96 = arith.mulf %95, %94 : vector<8x128xf32>
    %97 = math.tanh %89 : vector<8x128xf32>
    %98 = vector.extract_strided_slice %96 {offsets = [0, 0], sizes = [8, 24], strides = [1, 1]} : vector<8x128xf32> to vector<8x24xf32>
    %99 = vector.extract_strided_slice %96 {offsets = [0, 24], sizes = [8, 24], strides = [1, 1]} : vector<8x128xf32> to vector<8x24xf32>
    %100 = vector.extract_strided_slice %97 {offsets = [0, 48], sizes = [8, 24], strides = [1, 1]} : vector<8x128xf32> to vector<8x24xf32>
    %101 = vector.extract_strided_slice %96 {offsets = [0, 72], sizes = [8, 24], strides = [1, 1]} : vector<8x128xf32> to vector<8x24xf32>
    %102 = arith.mulf %99, %41 : vector<8x24xf32>
    %103 = arith.mulf %98, %100 : vector<8x24xf32>
    %104 = arith.addf %102, %103 : vector<8x24xf32>
    %105 = math.tanh %104 : vector<8x24xf32>
    %106 = arith.mulf %101, %105 : vector<8x24xf32>
    %107 = tpu.concatenate %41, %104 in 1 : vector<8x24xf32>, vector<8x24xf32> -> vector<8x48xf32>
    %cst_41 = arith.constant dense<0.000000e+00> : vector<8x16xf32>
    %108 = tpu.matmul %107, %3, %cst_41 {dimension_numbers = #tpu.dot_dimension_numbers<[1], [0], [0], [1], [0, 0, 1, 1], [], []>} : vector<8x48xf32>, vector<48x16xf32>, vector<8x16xf32> -> vector<8x16xf32>
    %109 = vector.broadcast %4 : vector<1x16xf32> to vector<8x16xf32>
    %110 = arith.addf %108, %109 : vector<8x16xf32>
    %cst_42 = arith.constant 0.000000e+00 : f32
    %111 = vector.broadcast %cst_42 : f32 to vector<8x16xf32>
    %112 = arith.maximumf %110, %111 : vector<8x16xf32>
    %cst_43 = arith.constant dense<0.000000e+00> : vector<8x48xf32>
    %113 = tpu.matmul %112, %5, %cst_43 {dimension_numbers = #tpu.dot_dimension_numbers<[1], [0], [0], [1], [0, 0, 1, 1], [], []>} : vector<8x16xf32>, vector<16x48xf32>, vector<8x48xf32> -> vector<8x48xf32>
    %114 = vector.broadcast %6 : vector<1x48xf32> to vector<8x48xf32>
    %115 = arith.addf %113, %114 : vector<8x48xf32>
    %cst_44 = arith.constant dense<0xFF800000> : vector<8xf32>
    %116 = vector.multi_reduction <maximumf>, %115, %cst_44 [1] : vector<8x48xf32> to vector<8xf32>
    %117 = vector.shape_cast %116 : vector<8xf32> to vector<8x1xf32>
    %118 = vector.broadcast %117 : vector<8x1xf32> to vector<8x48xf32>
    %119 = arith.subf %115, %118 : vector<8x48xf32>
    %120 = math.exp %119 : vector<8x48xf32>
    %cst_45 = arith.constant dense<0.000000e+00> : vector<8xf32>
    %121 = vector.multi_reduction <add>, %120, %cst_45 [1] : vector<8x48xf32> to vector<8xf32>
    %122 = vector.shape_cast %121 : vector<8xf32> to vector<8x1xf32>
    %123 = tpu.reciprocal %122 {approx = true} : vector<8x1xf32> -> vector<8x1xf32>
    %124 = vector.broadcast %123 : vector<8x1xf32> to vector<8x48xf32>
    %125 = arith.mulf %120, %124 : vector<8x48xf32>
    %126 = arith.mulf %125, %107 : vector<8x48xf32>
    %127 = tpu.concatenate %126, %86 in 1 : vector<8x48xf32>, vector<8x16xf32> -> vector<8x64xf32>
    %cst_46 = arith.constant dense<0.000000e+00> : vector<8x48xf32>
    %128 = tpu.matmul %127, %7, %cst_46 {dimension_numbers = #tpu.dot_dimension_numbers<[1], [0], [0], [1], [0, 0, 1, 1], [], []>} : vector<8x64xf32>, vector<64x48xf32>, vector<8x48xf32> -> vector<8x48xf32>
    %129 = vector.broadcast %8 : vector<1x48xf32> to vector<8x48xf32>
    %130 = arith.addf %128, %129 : vector<8x48xf32>
    %cst_47 = arith.constant 0.000000e+00 : f32
    %131 = vector.broadcast %cst_47 : f32 to vector<8x48xf32>
    %132 = arith.maximumf %130, %131 : vector<8x48xf32>
    %cst_48 = arith.constant dense<0.000000e+00> : vector<8x128xf32>
    %133 = tpu.matmul %132, %9, %cst_48 {dimension_numbers = #tpu.dot_dimension_numbers<[1], [0], [0], [1], [0, 0, 1, 1], [], []>} : vector<8x48xf32>, vector<48x128xf32>, vector<8x128xf32> -> vector<8x128xf32>
    %134 = vector.broadcast %10 : vector<1x128xf32> to vector<8x128xf32>
    %135 = arith.addf %133, %134 : vector<8x128xf32>
    %cst_49 = arith.constant 5.000000e-01 : f32
    %136 = vector.broadcast %cst_49 : f32 to vector<8x128xf32>
    %137 = arith.mulf %136, %135 : vector<8x128xf32>
    %138 = math.tanh %137 : vector<8x128xf32>
    %cst_50 = arith.constant 1.000000e+00 : f32
    %139 = vector.broadcast %cst_50 : f32 to vector<8x128xf32>
    %140 = arith.addf %138, %139 : vector<8x128xf32>
    %cst_51 = arith.constant 5.000000e-01 : f32
    %141 = vector.broadcast %cst_51 : f32 to vector<8x128xf32>
    %142 = arith.mulf %141, %140 : vector<8x128xf32>
    %143 = math.tanh %135 : vector<8x128xf32>
    %144 = vector.extract_strided_slice %142 {offsets = [0, 0], sizes = [8, 16], strides = [1, 1]} : vector<8x128xf32> to vector<8x16xf32>
    %145 = vector.extract_strided_slice %142 {offsets = [0, 16], sizes = [8, 16], strides = [1, 1]} : vector<8x128xf32> to vector<8x16xf32>
    %146 = vector.extract_strided_slice %143 {offsets = [0, 32], sizes = [8, 16], strides = [1, 1]} : vector<8x128xf32> to vector<8x16xf32>
    %147 = arith.mulf %144, %86 : vector<8x16xf32>
    %148 = arith.mulf %145, %146 : vector<8x16xf32>
    %149 = arith.addf %147, %148 : vector<8x16xf32>
    %cst_52 = arith.constant dense<0.000000e+00> : vector<8x128xf32>
    %150 = tpu.matmul %106, %1, %cst_52 {dimension_numbers = #tpu.dot_dimension_numbers<[1], [0], [0], [1], [0, 0, 1, 1], [], []>} : vector<8x24xf32>, vector<24x128xf32>, vector<8x128xf32> -> vector<8x128xf32>
    %151 = vector.extract_strided_slice %20 {offsets = [16, 0], sizes = [8, 128], strides = [1, 1]} : vector<48x128xf32> to vector<8x128xf32>
    %152 = arith.addf %150, %151 : vector<8x128xf32>
    %cst_53 = arith.constant 5.000000e-01 : f32
    %153 = vector.broadcast %cst_53 : f32 to vector<8x128xf32>
    %154 = arith.mulf %153, %152 : vector<8x128xf32>
    %155 = math.tanh %154 : vector<8x128xf32>
    %cst_54 = arith.constant 1.000000e+00 : f32
    %156 = vector.broadcast %cst_54 : f32 to vector<8x128xf32>
    %157 = arith.addf %155, %156 : vector<8x128xf32>
    %cst_55 = arith.constant 5.000000e-01 : f32
    %158 = vector.broadcast %cst_55 : f32 to vector<8x128xf32>
    %159 = arith.mulf %158, %157 : vector<8x128xf32>
    %160 = math.tanh %152 : vector<8x128xf32>
    %161 = vector.extract_strided_slice %159 {offsets = [0, 0], sizes = [8, 24], strides = [1, 1]} : vector<8x128xf32> to vector<8x24xf32>
    %162 = vector.extract_strided_slice %159 {offsets = [0, 24], sizes = [8, 24], strides = [1, 1]} : vector<8x128xf32> to vector<8x24xf32>
    %163 = vector.extract_strided_slice %160 {offsets = [0, 48], sizes = [8, 24], strides = [1, 1]} : vector<8x128xf32> to vector<8x24xf32>
    %164 = vector.extract_strided_slice %159 {offsets = [0, 72], sizes = [8, 24], strides = [1, 1]} : vector<8x128xf32> to vector<8x24xf32>
    %165 = arith.mulf %162, %104 : vector<8x24xf32>
    %166 = arith.mulf %161, %163 : vector<8x24xf32>
    %167 = arith.addf %165, %166 : vector<8x24xf32>
    %168 = math.tanh %167 : vector<8x24xf32>
    %169 = arith.mulf %164, %168 : vector<8x24xf32>
    %170 = tpu.concatenate %104, %167 in 1 : vector<8x24xf32>, vector<8x24xf32> -> vector<8x48xf32>
    %cst_56 = arith.constant dense<0.000000e+00> : vector<8x16xf32>
    %171 = tpu.matmul %170, %3, %cst_56 {dimension_numbers = #tpu.dot_dimension_numbers<[1], [0], [0], [1], [0, 0, 1, 1], [], []>} : vector<8x48xf32>, vector<48x16xf32>, vector<8x16xf32> -> vector<8x16xf32>
    %172 = vector.broadcast %4 : vector<1x16xf32> to vector<8x16xf32>
    %173 = arith.addf %171, %172 : vector<8x16xf32>
    %cst_57 = arith.constant 0.000000e+00 : f32
    %174 = vector.broadcast %cst_57 : f32 to vector<8x16xf32>
    %175 = arith.maximumf %173, %174 : vector<8x16xf32>
    %cst_58 = arith.constant dense<0.000000e+00> : vector<8x48xf32>
    %176 = tpu.matmul %175, %5, %cst_58 {dimension_numbers = #tpu.dot_dimension_numbers<[1], [0], [0], [1], [0, 0, 1, 1], [], []>} : vector<8x16xf32>, vector<16x48xf32>, vector<8x48xf32> -> vector<8x48xf32>
    %177 = vector.broadcast %6 : vector<1x48xf32> to vector<8x48xf32>
    %178 = arith.addf %176, %177 : vector<8x48xf32>
    %cst_59 = arith.constant dense<0xFF800000> : vector<8xf32>
    %179 = vector.multi_reduction <maximumf>, %178, %cst_59 [1] : vector<8x48xf32> to vector<8xf32>
    %180 = vector.shape_cast %179 : vector<8xf32> to vector<8x1xf32>
    %181 = vector.broadcast %180 : vector<8x1xf32> to vector<8x48xf32>
    %182 = arith.subf %178, %181 : vector<8x48xf32>
    %183 = math.exp %182 : vector<8x48xf32>
    %cst_60 = arith.constant dense<0.000000e+00> : vector<8xf32>
    %184 = vector.multi_reduction <add>, %183, %cst_60 [1] : vector<8x48xf32> to vector<8xf32>
    %185 = vector.shape_cast %184 : vector<8xf32> to vector<8x1xf32>
    %186 = tpu.reciprocal %185 {approx = true} : vector<8x1xf32> -> vector<8x1xf32>
    %187 = vector.broadcast %186 : vector<8x1xf32> to vector<8x48xf32>
    %188 = arith.mulf %183, %187 : vector<8x48xf32>
    %189 = arith.mulf %188, %170 : vector<8x48xf32>
    %190 = tpu.concatenate %189, %149 in 1 : vector<8x48xf32>, vector<8x16xf32> -> vector<8x64xf32>
    %cst_61 = arith.constant dense<0.000000e+00> : vector<8x48xf32>
    %191 = tpu.matmul %190, %7, %cst_61 {dimension_numbers = #tpu.dot_dimension_numbers<[1], [0], [0], [1], [0, 0, 1, 1], [], []>} : vector<8x64xf32>, vector<64x48xf32>, vector<8x48xf32> -> vector<8x48xf32>
    %192 = vector.broadcast %8 : vector<1x48xf32> to vector<8x48xf32>
    %193 = arith.addf %191, %192 : vector<8x48xf32>
    %cst_62 = arith.constant 0.000000e+00 : f32
    %194 = vector.broadcast %cst_62 : f32 to vector<8x48xf32>
    %195 = arith.maximumf %193, %194 : vector<8x48xf32>
    %cst_63 = arith.constant dense<0.000000e+00> : vector<8x128xf32>
    %196 = tpu.matmul %195, %9, %cst_63 {dimension_numbers = #tpu.dot_dimension_numbers<[1], [0], [0], [1], [0, 0, 1, 1], [], []>} : vector<8x48xf32>, vector<48x128xf32>, vector<8x128xf32> -> vector<8x128xf32>
    %197 = vector.broadcast %10 : vector<1x128xf32> to vector<8x128xf32>
    %198 = arith.addf %196, %197 : vector<8x128xf32>
    %cst_64 = arith.constant 5.000000e-01 : f32
    %199 = vector.broadcast %cst_64 : f32 to vector<8x128xf32>
    %200 = arith.mulf %199, %198 : vector<8x128xf32>
    %201 = math.tanh %200 : vector<8x128xf32>
    %cst_65 = arith.constant 1.000000e+00 : f32
    %202 = vector.broadcast %cst_65 : f32 to vector<8x128xf32>
    %203 = arith.addf %201, %202 : vector<8x128xf32>
    %cst_66 = arith.constant 5.000000e-01 : f32
    %204 = vector.broadcast %cst_66 : f32 to vector<8x128xf32>
    %205 = arith.mulf %204, %203 : vector<8x128xf32>
    %206 = math.tanh %198 : vector<8x128xf32>
    %207 = vector.extract_strided_slice %205 {offsets = [0, 0], sizes = [8, 16], strides = [1, 1]} : vector<8x128xf32> to vector<8x16xf32>
    %208 = vector.extract_strided_slice %205 {offsets = [0, 16], sizes = [8, 16], strides = [1, 1]} : vector<8x128xf32> to vector<8x16xf32>
    %209 = vector.extract_strided_slice %206 {offsets = [0, 32], sizes = [8, 16], strides = [1, 1]} : vector<8x128xf32> to vector<8x16xf32>
    %210 = arith.mulf %207, %149 : vector<8x16xf32>
    %211 = arith.mulf %208, %209 : vector<8x16xf32>
    %212 = arith.addf %210, %211 : vector<8x16xf32>
    %cst_67 = arith.constant dense<0.000000e+00> : vector<8x128xf32>
    %213 = tpu.matmul %169, %1, %cst_67 {dimension_numbers = #tpu.dot_dimension_numbers<[1], [0], [0], [1], [0, 0, 1, 1], [], []>} : vector<8x24xf32>, vector<24x128xf32>, vector<8x128xf32> -> vector<8x128xf32>
    %214 = vector.extract_strided_slice %20 {offsets = [24, 0], sizes = [8, 128], strides = [1, 1]} : vector<48x128xf32> to vector<8x128xf32>
    %215 = arith.addf %213, %214 : vector<8x128xf32>
    %cst_68 = arith.constant 5.000000e-01 : f32
    %216 = vector.broadcast %cst_68 : f32 to vector<8x128xf32>
    %217 = arith.mulf %216, %215 : vector<8x128xf32>
    %218 = math.tanh %217 : vector<8x128xf32>
    %cst_69 = arith.constant 1.000000e+00 : f32
    %219 = vector.broadcast %cst_69 : f32 to vector<8x128xf32>
    %220 = arith.addf %218, %219 : vector<8x128xf32>
    %cst_70 = arith.constant 5.000000e-01 : f32
    %221 = vector.broadcast %cst_70 : f32 to vector<8x128xf32>
    %222 = arith.mulf %221, %220 : vector<8x128xf32>
    %223 = math.tanh %215 : vector<8x128xf32>
    %224 = vector.extract_strided_slice %222 {offsets = [0, 0], sizes = [8, 24], strides = [1, 1]} : vector<8x128xf32> to vector<8x24xf32>
    %225 = vector.extract_strided_slice %222 {offsets = [0, 24], sizes = [8, 24], strides = [1, 1]} : vector<8x128xf32> to vector<8x24xf32>
    %226 = vector.extract_strided_slice %223 {offsets = [0, 48], sizes = [8, 24], strides = [1, 1]} : vector<8x128xf32> to vector<8x24xf32>
    %227 = vector.extract_strided_slice %222 {offsets = [0, 72], sizes = [8, 24], strides = [1, 1]} : vector<8x128xf32> to vector<8x24xf32>
    %228 = arith.mulf %225, %167 : vector<8x24xf32>
    %229 = arith.mulf %224, %226 : vector<8x24xf32>
    %230 = arith.addf %228, %229 : vector<8x24xf32>
    %231 = math.tanh %230 : vector<8x24xf32>
    %232 = arith.mulf %227, %231 : vector<8x24xf32>
    %233 = tpu.concatenate %167, %230 in 1 : vector<8x24xf32>, vector<8x24xf32> -> vector<8x48xf32>
    %cst_71 = arith.constant dense<0.000000e+00> : vector<8x16xf32>
    %234 = tpu.matmul %233, %3, %cst_71 {dimension_numbers = #tpu.dot_dimension_numbers<[1], [0], [0], [1], [0, 0, 1, 1], [], []>} : vector<8x48xf32>, vector<48x16xf32>, vector<8x16xf32> -> vector<8x16xf32>
    %235 = vector.broadcast %4 : vector<1x16xf32> to vector<8x16xf32>
    %236 = arith.addf %234, %235 : vector<8x16xf32>
    %cst_72 = arith.constant 0.000000e+00 : f32
    %237 = vector.broadcast %cst_72 : f32 to vector<8x16xf32>
    %238 = arith.maximumf %236, %237 : vector<8x16xf32>
    %cst_73 = arith.constant dense<0.000000e+00> : vector<8x48xf32>
    %239 = tpu.matmul %238, %5, %cst_73 {dimension_numbers = #tpu.dot_dimension_numbers<[1], [0], [0], [1], [0, 0, 1, 1], [], []>} : vector<8x16xf32>, vector<16x48xf32>, vector<8x48xf32> -> vector<8x48xf32>
    %240 = vector.broadcast %6 : vector<1x48xf32> to vector<8x48xf32>
    %241 = arith.addf %239, %240 : vector<8x48xf32>
    %cst_74 = arith.constant dense<0xFF800000> : vector<8xf32>
    %242 = vector.multi_reduction <maximumf>, %241, %cst_74 [1] : vector<8x48xf32> to vector<8xf32>
    %243 = vector.shape_cast %242 : vector<8xf32> to vector<8x1xf32>
    %244 = vector.broadcast %243 : vector<8x1xf32> to vector<8x48xf32>
    %245 = arith.subf %241, %244 : vector<8x48xf32>
    %246 = math.exp %245 : vector<8x48xf32>
    %cst_75 = arith.constant dense<0.000000e+00> : vector<8xf32>
    %247 = vector.multi_reduction <add>, %246, %cst_75 [1] : vector<8x48xf32> to vector<8xf32>
    %248 = vector.shape_cast %247 : vector<8xf32> to vector<8x1xf32>
    %249 = tpu.reciprocal %248 {approx = true} : vector<8x1xf32> -> vector<8x1xf32>
    %250 = vector.broadcast %249 : vector<8x1xf32> to vector<8x48xf32>
    %251 = arith.mulf %246, %250 : vector<8x48xf32>
    %252 = arith.mulf %251, %233 : vector<8x48xf32>
    %253 = tpu.concatenate %252, %212 in 1 : vector<8x48xf32>, vector<8x16xf32> -> vector<8x64xf32>
    %cst_76 = arith.constant dense<0.000000e+00> : vector<8x48xf32>
    %254 = tpu.matmul %253, %7, %cst_76 {dimension_numbers = #tpu.dot_dimension_numbers<[1], [0], [0], [1], [0, 0, 1, 1], [], []>} : vector<8x64xf32>, vector<64x48xf32>, vector<8x48xf32> -> vector<8x48xf32>
    %255 = vector.broadcast %8 : vector<1x48xf32> to vector<8x48xf32>
    %256 = arith.addf %254, %255 : vector<8x48xf32>
    %cst_77 = arith.constant 0.000000e+00 : f32
    %257 = vector.broadcast %cst_77 : f32 to vector<8x48xf32>
    %258 = arith.maximumf %256, %257 : vector<8x48xf32>
    %cst_78 = arith.constant dense<0.000000e+00> : vector<8x128xf32>
    %259 = tpu.matmul %258, %9, %cst_78 {dimension_numbers = #tpu.dot_dimension_numbers<[1], [0], [0], [1], [0, 0, 1, 1], [], []>} : vector<8x48xf32>, vector<48x128xf32>, vector<8x128xf32> -> vector<8x128xf32>
    %260 = vector.broadcast %10 : vector<1x128xf32> to vector<8x128xf32>
    %261 = arith.addf %259, %260 : vector<8x128xf32>
    %cst_79 = arith.constant 5.000000e-01 : f32
    %262 = vector.broadcast %cst_79 : f32 to vector<8x128xf32>
    %263 = arith.mulf %262, %261 : vector<8x128xf32>
    %264 = math.tanh %263 : vector<8x128xf32>
    %cst_80 = arith.constant 1.000000e+00 : f32
    %265 = vector.broadcast %cst_80 : f32 to vector<8x128xf32>
    %266 = arith.addf %264, %265 : vector<8x128xf32>
    %cst_81 = arith.constant 5.000000e-01 : f32
    %267 = vector.broadcast %cst_81 : f32 to vector<8x128xf32>
    %268 = arith.mulf %267, %266 : vector<8x128xf32>
    %269 = math.tanh %261 : vector<8x128xf32>
    %270 = vector.extract_strided_slice %268 {offsets = [0, 0], sizes = [8, 16], strides = [1, 1]} : vector<8x128xf32> to vector<8x16xf32>
    %271 = vector.extract_strided_slice %268 {offsets = [0, 16], sizes = [8, 16], strides = [1, 1]} : vector<8x128xf32> to vector<8x16xf32>
    %272 = vector.extract_strided_slice %269 {offsets = [0, 32], sizes = [8, 16], strides = [1, 1]} : vector<8x128xf32> to vector<8x16xf32>
    %273 = arith.mulf %270, %212 : vector<8x16xf32>
    %274 = arith.mulf %271, %272 : vector<8x16xf32>
    %275 = arith.addf %273, %274 : vector<8x16xf32>
    %cst_82 = arith.constant dense<0.000000e+00> : vector<8x128xf32>
    %276 = tpu.matmul %232, %1, %cst_82 {dimension_numbers = #tpu.dot_dimension_numbers<[1], [0], [0], [1], [0, 0, 1, 1], [], []>} : vector<8x24xf32>, vector<24x128xf32>, vector<8x128xf32> -> vector<8x128xf32>
    %277 = vector.extract_strided_slice %20 {offsets = [32, 0], sizes = [8, 128], strides = [1, 1]} : vector<48x128xf32> to vector<8x128xf32>
    %278 = arith.addf %276, %277 : vector<8x128xf32>
    %cst_83 = arith.constant 5.000000e-01 : f32
    %279 = vector.broadcast %cst_83 : f32 to vector<8x128xf32>
    %280 = arith.mulf %279, %278 : vector<8x128xf32>
    %281 = math.tanh %280 : vector<8x128xf32>
    %cst_84 = arith.constant 1.000000e+00 : f32
    %282 = vector.broadcast %cst_84 : f32 to vector<8x128xf32>
    %283 = arith.addf %281, %282 : vector<8x128xf32>
    %cst_85 = arith.constant 5.000000e-01 : f32
    %284 = vector.broadcast %cst_85 : f32 to vector<8x128xf32>
    %285 = arith.mulf %284, %283 : vector<8x128xf32>
    %286 = math.tanh %278 : vector<8x128xf32>
    %287 = vector.extract_strided_slice %285 {offsets = [0, 0], sizes = [8, 24], strides = [1, 1]} : vector<8x128xf32> to vector<8x24xf32>
    %288 = vector.extract_strided_slice %285 {offsets = [0, 24], sizes = [8, 24], strides = [1, 1]} : vector<8x128xf32> to vector<8x24xf32>
    %289 = vector.extract_strided_slice %286 {offsets = [0, 48], sizes = [8, 24], strides = [1, 1]} : vector<8x128xf32> to vector<8x24xf32>
    %290 = vector.extract_strided_slice %285 {offsets = [0, 72], sizes = [8, 24], strides = [1, 1]} : vector<8x128xf32> to vector<8x24xf32>
    %291 = arith.mulf %288, %230 : vector<8x24xf32>
    %292 = arith.mulf %287, %289 : vector<8x24xf32>
    %293 = arith.addf %291, %292 : vector<8x24xf32>
    %294 = math.tanh %293 : vector<8x24xf32>
    %295 = arith.mulf %290, %294 : vector<8x24xf32>
    %296 = tpu.concatenate %230, %293 in 1 : vector<8x24xf32>, vector<8x24xf32> -> vector<8x48xf32>
    %cst_86 = arith.constant dense<0.000000e+00> : vector<8x16xf32>
    %297 = tpu.matmul %296, %3, %cst_86 {dimension_numbers = #tpu.dot_dimension_numbers<[1], [0], [0], [1], [0, 0, 1, 1], [], []>} : vector<8x48xf32>, vector<48x16xf32>, vector<8x16xf32> -> vector<8x16xf32>
    %298 = vector.broadcast %4 : vector<1x16xf32> to vector<8x16xf32>
    %299 = arith.addf %297, %298 : vector<8x16xf32>
    %cst_87 = arith.constant 0.000000e+00 : f32
    %300 = vector.broadcast %cst_87 : f32 to vector<8x16xf32>
    %301 = arith.maximumf %299, %300 : vector<8x16xf32>
    %cst_88 = arith.constant dense<0.000000e+00> : vector<8x48xf32>
    %302 = tpu.matmul %301, %5, %cst_88 {dimension_numbers = #tpu.dot_dimension_numbers<[1], [0], [0], [1], [0, 0, 1, 1], [], []>} : vector<8x16xf32>, vector<16x48xf32>, vector<8x48xf32> -> vector<8x48xf32>
    %303 = vector.broadcast %6 : vector<1x48xf32> to vector<8x48xf32>
    %304 = arith.addf %302, %303 : vector<8x48xf32>
    %cst_89 = arith.constant dense<0xFF800000> : vector<8xf32>
    %305 = vector.multi_reduction <maximumf>, %304, %cst_89 [1] : vector<8x48xf32> to vector<8xf32>
    %306 = vector.shape_cast %305 : vector<8xf32> to vector<8x1xf32>
    %307 = vector.broadcast %306 : vector<8x1xf32> to vector<8x48xf32>
    %308 = arith.subf %304, %307 : vector<8x48xf32>
    %309 = math.exp %308 : vector<8x48xf32>
    %cst_90 = arith.constant dense<0.000000e+00> : vector<8xf32>
    %310 = vector.multi_reduction <add>, %309, %cst_90 [1] : vector<8x48xf32> to vector<8xf32>
    %311 = vector.shape_cast %310 : vector<8xf32> to vector<8x1xf32>
    %312 = tpu.reciprocal %311 {approx = true} : vector<8x1xf32> -> vector<8x1xf32>
    %313 = vector.broadcast %312 : vector<8x1xf32> to vector<8x48xf32>
    %314 = arith.mulf %309, %313 : vector<8x48xf32>
    %315 = arith.mulf %314, %296 : vector<8x48xf32>
    %316 = tpu.concatenate %315, %275 in 1 : vector<8x48xf32>, vector<8x16xf32> -> vector<8x64xf32>
    %cst_91 = arith.constant dense<0.000000e+00> : vector<8x48xf32>
    %317 = tpu.matmul %316, %7, %cst_91 {dimension_numbers = #tpu.dot_dimension_numbers<[1], [0], [0], [1], [0, 0, 1, 1], [], []>} : vector<8x64xf32>, vector<64x48xf32>, vector<8x48xf32> -> vector<8x48xf32>
    %318 = vector.broadcast %8 : vector<1x48xf32> to vector<8x48xf32>
    %319 = arith.addf %317, %318 : vector<8x48xf32>
    %cst_92 = arith.constant 0.000000e+00 : f32
    %320 = vector.broadcast %cst_92 : f32 to vector<8x48xf32>
    %321 = arith.maximumf %319, %320 : vector<8x48xf32>
    %cst_93 = arith.constant dense<0.000000e+00> : vector<8x128xf32>
    %322 = tpu.matmul %321, %9, %cst_93 {dimension_numbers = #tpu.dot_dimension_numbers<[1], [0], [0], [1], [0, 0, 1, 1], [], []>} : vector<8x48xf32>, vector<48x128xf32>, vector<8x128xf32> -> vector<8x128xf32>
    %323 = vector.broadcast %10 : vector<1x128xf32> to vector<8x128xf32>
    %324 = arith.addf %322, %323 : vector<8x128xf32>
    %cst_94 = arith.constant 5.000000e-01 : f32
    %325 = vector.broadcast %cst_94 : f32 to vector<8x128xf32>
    %326 = arith.mulf %325, %324 : vector<8x128xf32>
    %327 = math.tanh %326 : vector<8x128xf32>
    %cst_95 = arith.constant 1.000000e+00 : f32
    %328 = vector.broadcast %cst_95 : f32 to vector<8x128xf32>
    %329 = arith.addf %327, %328 : vector<8x128xf32>
    %cst_96 = arith.constant 5.000000e-01 : f32
    %330 = vector.broadcast %cst_96 : f32 to vector<8x128xf32>
    %331 = arith.mulf %330, %329 : vector<8x128xf32>
    %332 = math.tanh %324 : vector<8x128xf32>
    %333 = vector.extract_strided_slice %331 {offsets = [0, 0], sizes = [8, 16], strides = [1, 1]} : vector<8x128xf32> to vector<8x16xf32>
    %334 = vector.extract_strided_slice %331 {offsets = [0, 16], sizes = [8, 16], strides = [1, 1]} : vector<8x128xf32> to vector<8x16xf32>
    %335 = vector.extract_strided_slice %332 {offsets = [0, 32], sizes = [8, 16], strides = [1, 1]} : vector<8x128xf32> to vector<8x16xf32>
    %336 = arith.mulf %333, %275 : vector<8x16xf32>
    %337 = arith.mulf %334, %335 : vector<8x16xf32>
    %338 = arith.addf %336, %337 : vector<8x16xf32>
    %cst_97 = arith.constant dense<0.000000e+00> : vector<8x128xf32>
    %339 = tpu.matmul %295, %1, %cst_97 {dimension_numbers = #tpu.dot_dimension_numbers<[1], [0], [0], [1], [0, 0, 1, 1], [], []>} : vector<8x24xf32>, vector<24x128xf32>, vector<8x128xf32> -> vector<8x128xf32>
    %340 = vector.extract_strided_slice %20 {offsets = [40, 0], sizes = [8, 128], strides = [1, 1]} : vector<48x128xf32> to vector<8x128xf32>
    %341 = arith.addf %339, %340 : vector<8x128xf32>
    %cst_98 = arith.constant 5.000000e-01 : f32
    %342 = vector.broadcast %cst_98 : f32 to vector<8x128xf32>
    %343 = arith.mulf %342, %341 : vector<8x128xf32>
    %344 = math.tanh %343 : vector<8x128xf32>
    %cst_99 = arith.constant 1.000000e+00 : f32
    %345 = vector.broadcast %cst_99 : f32 to vector<8x128xf32>
    %346 = arith.addf %344, %345 : vector<8x128xf32>
    %cst_100 = arith.constant 5.000000e-01 : f32
    %347 = vector.broadcast %cst_100 : f32 to vector<8x128xf32>
    %348 = arith.mulf %347, %346 : vector<8x128xf32>
    %349 = math.tanh %341 : vector<8x128xf32>
    %350 = vector.extract_strided_slice %348 {offsets = [0, 0], sizes = [8, 24], strides = [1, 1]} : vector<8x128xf32> to vector<8x24xf32>
    %351 = vector.extract_strided_slice %348 {offsets = [0, 24], sizes = [8, 24], strides = [1, 1]} : vector<8x128xf32> to vector<8x24xf32>
    %352 = vector.extract_strided_slice %349 {offsets = [0, 48], sizes = [8, 24], strides = [1, 1]} : vector<8x128xf32> to vector<8x24xf32>
    %353 = vector.extract_strided_slice %348 {offsets = [0, 72], sizes = [8, 24], strides = [1, 1]} : vector<8x128xf32> to vector<8x24xf32>
    %354 = arith.mulf %351, %293 : vector<8x24xf32>
    %355 = arith.mulf %350, %352 : vector<8x24xf32>
    %356 = arith.addf %354, %355 : vector<8x24xf32>
    %357 = math.tanh %356 : vector<8x24xf32>
    %358 = arith.mulf %353, %357 : vector<8x24xf32>
    %359 = tpu.concatenate %293, %356 in 1 : vector<8x24xf32>, vector<8x24xf32> -> vector<8x48xf32>
    %cst_101 = arith.constant dense<0.000000e+00> : vector<8x16xf32>
    %360 = tpu.matmul %359, %3, %cst_101 {dimension_numbers = #tpu.dot_dimension_numbers<[1], [0], [0], [1], [0, 0, 1, 1], [], []>} : vector<8x48xf32>, vector<48x16xf32>, vector<8x16xf32> -> vector<8x16xf32>
    %361 = vector.broadcast %4 : vector<1x16xf32> to vector<8x16xf32>
    %362 = arith.addf %360, %361 : vector<8x16xf32>
    %cst_102 = arith.constant 0.000000e+00 : f32
    %363 = vector.broadcast %cst_102 : f32 to vector<8x16xf32>
    %364 = arith.maximumf %362, %363 : vector<8x16xf32>
    %cst_103 = arith.constant dense<0.000000e+00> : vector<8x48xf32>
    %365 = tpu.matmul %364, %5, %cst_103 {dimension_numbers = #tpu.dot_dimension_numbers<[1], [0], [0], [1], [0, 0, 1, 1], [], []>} : vector<8x16xf32>, vector<16x48xf32>, vector<8x48xf32> -> vector<8x48xf32>
    %366 = vector.broadcast %6 : vector<1x48xf32> to vector<8x48xf32>
    %367 = arith.addf %365, %366 : vector<8x48xf32>
    %cst_104 = arith.constant dense<0xFF800000> : vector<8xf32>
    %368 = vector.multi_reduction <maximumf>, %367, %cst_104 [1] : vector<8x48xf32> to vector<8xf32>
    %369 = vector.shape_cast %368 : vector<8xf32> to vector<8x1xf32>
    %370 = vector.broadcast %369 : vector<8x1xf32> to vector<8x48xf32>
    %371 = arith.subf %367, %370 : vector<8x48xf32>
    %372 = math.exp %371 : vector<8x48xf32>
    %cst_105 = arith.constant dense<0.000000e+00> : vector<8xf32>
    %373 = vector.multi_reduction <add>, %372, %cst_105 [1] : vector<8x48xf32> to vector<8xf32>
    %374 = vector.shape_cast %373 : vector<8xf32> to vector<8x1xf32>
    %375 = tpu.reciprocal %374 {approx = true} : vector<8x1xf32> -> vector<8x1xf32>
    %376 = vector.broadcast %375 : vector<8x1xf32> to vector<8x48xf32>
    %377 = arith.mulf %372, %376 : vector<8x48xf32>
    %378 = arith.mulf %377, %359 : vector<8x48xf32>
    %379 = tpu.concatenate %378, %338 in 1 : vector<8x48xf32>, vector<8x16xf32> -> vector<8x64xf32>
    %cst_106 = arith.constant dense<0.000000e+00> : vector<8x48xf32>
    %380 = tpu.matmul %379, %7, %cst_106 {dimension_numbers = #tpu.dot_dimension_numbers<[1], [0], [0], [1], [0, 0, 1, 1], [], []>} : vector<8x64xf32>, vector<64x48xf32>, vector<8x48xf32> -> vector<8x48xf32>
    %381 = vector.broadcast %8 : vector<1x48xf32> to vector<8x48xf32>
    %382 = arith.addf %380, %381 : vector<8x48xf32>
    %cst_107 = arith.constant 0.000000e+00 : f32
    %383 = vector.broadcast %cst_107 : f32 to vector<8x48xf32>
    %384 = arith.maximumf %382, %383 : vector<8x48xf32>
    %cst_108 = arith.constant dense<0.000000e+00> : vector<8x128xf32>
    %385 = tpu.matmul %384, %9, %cst_108 {dimension_numbers = #tpu.dot_dimension_numbers<[1], [0], [0], [1], [0, 0, 1, 1], [], []>} : vector<8x48xf32>, vector<48x128xf32>, vector<8x128xf32> -> vector<8x128xf32>
    %386 = vector.broadcast %10 : vector<1x128xf32> to vector<8x128xf32>
    %387 = arith.addf %385, %386 : vector<8x128xf32>
    %cst_109 = arith.constant 5.000000e-01 : f32
    %388 = vector.broadcast %cst_109 : f32 to vector<8x128xf32>
    %389 = arith.mulf %388, %387 : vector<8x128xf32>
    %390 = math.tanh %389 : vector<8x128xf32>
    %cst_110 = arith.constant 1.000000e+00 : f32
    %391 = vector.broadcast %cst_110 : f32 to vector<8x128xf32>
    %392 = arith.addf %390, %391 : vector<8x128xf32>
    %cst_111 = arith.constant 5.000000e-01 : f32
    %393 = vector.broadcast %cst_111 : f32 to vector<8x128xf32>
    %394 = arith.mulf %393, %392 : vector<8x128xf32>
    %395 = math.tanh %387 : vector<8x128xf32>
    %396 = vector.extract_strided_slice %394 {offsets = [0, 0], sizes = [8, 16], strides = [1, 1]} : vector<8x128xf32> to vector<8x16xf32>
    %397 = vector.extract_strided_slice %394 {offsets = [0, 16], sizes = [8, 16], strides = [1, 1]} : vector<8x128xf32> to vector<8x16xf32>
    %398 = vector.extract_strided_slice %395 {offsets = [0, 32], sizes = [8, 16], strides = [1, 1]} : vector<8x128xf32> to vector<8x16xf32>
    %399 = arith.mulf %396, %338 : vector<8x16xf32>
    %400 = arith.mulf %397, %398 : vector<8x16xf32>
    %401 = arith.addf %399, %400 : vector<8x16xf32>
    %cst_112 = arith.constant dense<0.000000e+00> : vector<8x128xf32>
    %402 = tpu.matmul %358, %11, %cst_112 {dimension_numbers = #tpu.dot_dimension_numbers<[1], [0], [0], [1], [0, 0, 1, 1], [], []>} : vector<8x24xf32>, vector<24x128xf32>, vector<8x128xf32> -> vector<8x128xf32>
    %403 = vector.broadcast %12 : vector<1x128xf32> to vector<8x128xf32>
    %404 = arith.addf %402, %403 : vector<8x128xf32>
    %405 = tpu.iota {dimensions = array<i32: 0>} : vector<8x128xi32>
    %c4_i32 = arith.constant 4 : i32
    %406 = vector.broadcast %c4_i32 : i32 to vector<8x128xi32>
    %407 = arith.cmpi slt, %405, %406 : vector<8x128xi32>
    %cst_113 = arith.constant 0xFF800000 : f32
    %408 = vector.broadcast %cst_113 : f32 to vector<8x128xf32>
    %409 = arith.select %407, %404, %408 : vector<8x128xi1>, vector<8x128xf32>
    %410 = vector.extract_strided_slice %409 {offsets = [0, 0], sizes = [8, 16], strides = [1, 1]} : vector<8x128xf32> to vector<8x16xf32>
    %411 = vector.shape_cast %410 : vector<8x16xf32> to vector<1x8x16xf32>
    %cst_114 = arith.constant dense<0xFF800000> : vector<1xf32>
    %412 = vector.multi_reduction <maximumf>, %411, %cst_114 [1, 2] : vector<1x8x16xf32> to vector<1xf32>
    %413 = vector.shape_cast %412 : vector<1xf32> to vector<1x1x1xf32>
    %414 = vector.extract %413[0, 0, 0] : f32 from vector<1x1x1xf32>
    %415 = vector.extract_strided_slice %409 {offsets = [0, 16], sizes = [8, 16], strides = [1, 1]} : vector<8x128xf32> to vector<8x16xf32>
    %416 = vector.shape_cast %415 : vector<8x16xf32> to vector<1x8x16xf32>
    %cst_115 = arith.constant dense<0xFF800000> : vector<1xf32>
    %417 = vector.multi_reduction <maximumf>, %416, %cst_115 [1, 2] : vector<1x8x16xf32> to vector<1xf32>
    %418 = vector.shape_cast %417 : vector<1xf32> to vector<1x1x1xf32>
    %419 = vector.extract %418[0, 0, 0] : f32 from vector<1x1x1xf32>
    %420 = vector.extract_strided_slice %409 {offsets = [0, 32], sizes = [8, 16], strides = [1, 1]} : vector<8x128xf32> to vector<8x16xf32>
    %421 = vector.shape_cast %420 : vector<8x16xf32> to vector<1x8x16xf32>
    %cst_116 = arith.constant dense<0xFF800000> : vector<1xf32>
    %422 = vector.multi_reduction <maximumf>, %421, %cst_116 [1, 2] : vector<1x8x16xf32> to vector<1xf32>
    %423 = vector.shape_cast %422 : vector<1xf32> to vector<1x1x1xf32>
    %424 = vector.extract %423[0, 0, 0] : f32 from vector<1x1x1xf32>
    %425 = vector.extract_strided_slice %404 {offsets = [0, 0], sizes = [8, 16], strides = [1, 1]} : vector<8x128xf32> to vector<8x16xf32>
    %426 = vector.broadcast %414 : f32 to vector<8x16xf32>
    %427 = arith.subf %425, %426 : vector<8x16xf32>
    %428 = vector.extract_strided_slice %404 {offsets = [0, 16], sizes = [8, 16], strides = [1, 1]} : vector<8x128xf32> to vector<8x16xf32>
    %429 = vector.broadcast %419 : f32 to vector<8x16xf32>
    %430 = arith.subf %428, %429 : vector<8x16xf32>
    %431 = vector.extract_strided_slice %404 {offsets = [0, 32], sizes = [8, 16], strides = [1, 1]} : vector<8x128xf32> to vector<8x16xf32>
    %432 = vector.broadcast %424 : f32 to vector<8x16xf32>
    %433 = arith.subf %431, %432 : vector<8x16xf32>
    %434 = tpu.concatenate %427, %430, %433 in 1 : vector<8x16xf32>, vector<8x16xf32>, vector<8x16xf32> -> vector<8x48xf32>
    %cst_117 = arith.constant 5.000000e-01 : f32
    %435 = vector.broadcast %cst_117 : f32 to vector<8x48xf32>
    %436 = arith.mulf %435, %434 : vector<8x48xf32>
    %437 = math.exp %436 : vector<8x48xf32>
    %438 = arith.mulf %437, %434 : vector<8x48xf32>
    %439 = vector.extract_strided_slice %438 {offsets = [0, 0], sizes = [8, 16], strides = [1, 1]} : vector<8x48xf32> to vector<8x16xf32>
    %440 = vector.extract_strided_slice %438 {offsets = [0, 16], sizes = [8, 16], strides = [1, 1]} : vector<8x48xf32> to vector<8x16xf32>
    %441 = arith.addf %439, %440 : vector<8x16xf32>
    %442 = vector.extract_strided_slice %438 {offsets = [0, 32], sizes = [8, 16], strides = [1, 1]} : vector<8x48xf32> to vector<8x16xf32>
    %443 = arith.addf %441, %442 : vector<8x16xf32>
    %444 = tpu.concatenate %443, %401 in 1 : vector<8x16xf32>, vector<8x16xf32> -> vector<8x32xf32>
    %cst_118 = arith.constant dense<0.000000e+00> : vector<8x16xf32>
    %445 = tpu.matmul %444, %13, %cst_118 {dimension_numbers = #tpu.dot_dimension_numbers<[1], [0], [0], [1], [0, 0, 1, 1], [], []>} : vector<8x32xf32>, vector<32x16xf32>, vector<8x16xf32> -> vector<8x16xf32>
    %446 = vector.broadcast %14 : vector<1x16xf32> to vector<8x16xf32>
    %447 = arith.addf %445, %446 : vector<8x16xf32>
    %cst_119 = arith.constant 0.000000e+00 : f32
    %448 = vector.broadcast %cst_119 : f32 to vector<8x16xf32>
    %449 = arith.maximumf %447, %448 : vector<8x16xf32>
    %cst_120 = arith.constant dense<0.000000e+00> : vector<8x1xf32>
    %450 = tpu.matmul %449, %15, %cst_120 {dimension_numbers = #tpu.dot_dimension_numbers<[1], [0], [0], [1], [0, 0, 1, 1], [], []>} : vector<8x16xf32>, vector<16x1xf32>, vector<8x1xf32> -> vector<8x1xf32>
    %451 = vector.broadcast %16 : vector<1x1xf32> to vector<8x1xf32>
    %452 = arith.addf %450, %451 : vector<8x1xf32>
    %c0_121 = arith.constant 0 : index
    %c0_122 = arith.constant 0 : index
    %453 = vector.load %arg2[%c0_121, %c0_122] : memref<8x1xf32, #tpu.memory_space<vmem>>, vector<8x1xf32>
    tpu.vector_store %arg2[%c0_121, %c0_122], %452 {strides = array<i32>} : memref<8x1xf32, #tpu.memory_space<vmem>>, vector<8x1xf32>,
    return
  }
}

</mosaic_0001>

<bundles_post_ra>
// kernel: mfn_pallas.1
= control target key start
LH: loop header
LB: loop body
LE: loop exit
PB: predicated region body
PF: predicated region fallthrough
CT: control target
= control target key end

     0   :  { %7 = vsyncpa [#allocation3], 0  ;;  %s3917_s9 = smov [#allocation2]   ;;  %s4708_s0 = inlined_call_operand.vmem [shape: f32[48,24], index: 0, kind: input, shape index: {}]   ;;  %s4709_s1 = inlined_call_operand.hbm [shape: f32[360,128], index: 1, kind: input, shape index: {}]   ;;  %s4710_s2 = inlined_call_operand.vmem [shape: f32[8,1], index: 2, kind: output, shape index: {}]  }
   0x1   :  { %s15_s10 = sshll.u32 %s3917_s9, 4  ;;  %s16_s10 = int_to_ptr.vmem [resolvable:$true] %s15_s10 }
   0x2   :  { %s3903_s11 = scalar_lea.vmem %s16_s10, 5760  ;;  %p3908_p1 = scmp.lt.s32.totalorder %s16_s10, %s16_s10 }
   0x3   :  { %p3904_p0 = scmp.ne.s32.totalorder %s16_s10, %s3903_s11  ;;  %p3909_p2 = scmp.lt.s32.totalorder %s3903_s11, %s3903_s11 }
   0x5   :  { %p3910_p3 = por %p3909_p2, %p3908_p1 }
   0x7   :  { %p3911_p4 = pnand %p3910_p3, %p3904_p0 }
   0x9   :  { %3914 = shalt.err (!%p3911_p4)
}
   0xa   :  { %s3918_s12 = smov 128   ;;  %s3919_s13 = smov 8  }
   0xb   :  { %21 = dma.hbm_to_vmem [thread:$0]  %s4709_s1, 5760, %s16_s10, [#allocation3], %s3918_s12, %s3918_s12, %s3919_s13  }
   0xc   :  { %3915 = dma.done.wait [#allocation3], 5760  }
   0xd   :  { %3916 = vsyncadd [#allocation3], 4294961536  ;;  %v3920_v0 = vmov 0.0   ;;  %vm3921_vm0 = vmmov 0   ;;  %v27_v1 = vld [vmem:[#allocation2 + $0x10] sm:$0xff]  ;;  %v26_v2 = vld [vmem:[#allocation2 + $0x8] sm:$0xff] }
   0xe   :  { %3343 = vmatprep.subr.mxu1 %v3920_v0  ;;  %3349 = vmatprep.mubr.msk.f32.mxu1 %vm3921_vm0, %v3920_v0  ;;  %v3951_v3 = vld [vmem:[#allocation2 + $0x28] sm:$0xff]  ;;  %vm80_vm1 = vcmask 195584   ;;  %v70_v4 = vld [vmem:[%s4708_s0] sm:$0xff]  ;;  %v3961_v7 = vld [vmem:[#allocation2 + $0x18] sm:$0xff]  ;;  %s3923_s27 = smov 24   ;;  %vm294_vm2 = vcmask 392192  }
   0xf   :  { %3328 = vmatprep.subr.mxu0 %v27_v1  ;;  %3344 = vmatpush3.msra.mxu1 %v3951_v3  ;;  %v3957_v5 = vld [vmem:[#allocation2 + $0x20] sm:$0xff]  ;;  %v71_v8 = vld [vmem:[%s4708_s0 + $0x8] sm:$0xff]  ;;  %v3977_v11 = vld [vmem:[#allocation2 + $0x30] ss:$0 sm:$0xff]  ;;  %vm373_vm3 = vcmask 130048   ;;  %s3924_s28 = smov 48  }
  0x10   :  { %3329 = vmatpush3.msra.mxu0 %v27_v1  ;;  %v25_v6 = vld [vmem:[#allocation2] sm:$0xff]  ;;  %3345 = vmatprep.subr.mxu1 %v3920_v0  ;;  %v72_v17 = vld [vmem:[%s4708_s0 + $0x10] sm:$0xff]  ;;  %v73_v18 = vld [vmem:[%s4708_s0 + $0x18] sm:$0xff]  ;;  %s3925_s29 = smov 56   ;;  %vm464_vm4 = vcmask 523264   ;;  %s3926_s30 = smov 104  }
  0x11   :  { %3330 = vmatprep.subr.mxu0 %v26_v2  ;;  %3334 = vmatprep.mubr.msk.f32.mxu0 %vm80_vm1, %v70_v4  ;;  %v3980_v16 = vld [vmem:[#allocation2 + $0x60] sm:$0xff]  ;;  %v3990_v19 = vld [vmem:[#allocation2 + $0x58] sm:$0xff]  ;;  %v3997_v21 = vld [vmem:[#allocation2 + $0x50] sm:$0xff]  ;;  %s3927_s3 = smov 112   ;;  %vm2870_vm6 = vcmask 261248   ;;  %vm2881_vm7 = vcmask 392448  }
  0x12   :  { %3331 = vmatpush3.msra.mxu0 %v26_v2  ;;  %3346 = vmatpush3.msra.mxu1 %v3957_v5  ;;  %v74_v20 = vld [vmem:[%s4708_s0 + $0x20] sm:$0xff]  ;;  %v75_v22 = vld [vmem:[%s4708_s0 + $0x28] sm:$0xff]  ;;  %s3922_s0 = smov 80   ;;  %v4019_v27 = vld [vmem:[#allocation2 + $0x38] sm:$0xff]  ;;  %vm2899_vm8 = vcmask 261120   ;;  %s3928_s7 = smov 96  }
  0x13   :  { %3332 = vmatprep.subr.mxu0 %v25_v6  ;;  %3347 = vmatprep.subr.mxu1 %v3920_v0  ;;  %v4005_v23 = vld [vmem:[#allocation2 + $0x48] sm:$0xff]  ;;  %v4010_v24 = vld [vmem:[#allocation2 + $0x40] sm:$0xff]  ;;  %v4034_v37 = vld [vmem:[#allocation2 + $0x78] sm:$0xff]  ;;  %s3929_s8 = smov 16   ;;  %vm3074_vm9 = vcmask 7168  }
  0x14   :  { %3333 = vmatpush3.msra.mxu0 %v25_v6  ;;  %3348 = vmatpush3.msra.mxu1 %v3961_v7  ;;  %v4038_v38 = vld [vmem:[#allocation2 + $0x70] sm:$0xff]  ;;  %v4050_v43 = vld [vmem:[#allocation2 + $0x68] ss:$0 sm:$0xff]  ;;  %v4056_v48 = vld [vmem:[#allocation2 + $0x80] ss:$0 sm:$0xff] }
  0x15   :  { %3335 = vmatmul.mubr.msk.f32.vlgmr.msra.gmra.mxu0 %vm80_vm1, %v71_v8  ;;  %3350 = vmatmul.mubr.f32.vlgmr.msra.gmra.mxu1 %v3920_v0  ;;  %v4064_v61 = vld [vmem:[#allocation2 + $0xc0] sm:$0xff]  ;;  %v4066_v62 = vld [vmem:[#allocation2 + $0xb8] sm:$0xff]  ;;  %v4070_v63 = vld [vmem:[#allocation2 + $0xb0] sm:$0xff] }
  0x16   :  { %3352 = vmatprep.subr.mxu0 %v3920_v0  ;;  %3367 = vmatprep.subr.mxu1 %v3920_v0  ;;  %v4074_v1 = vld [vmem:[#allocation2 + $0xa8] sm:$0xff]  ;;  %v4078_v2 = vld [vmem:[#allocation2 + $0xa0] sm:$0xff]  ;;  %v4082_v4 = vld [vmem:[#allocation2 + $0x98] sm:$0xff] }
  0x17   :  { %3371 = vmatprep.mubr.msk.f32.mxu1 %vm3921_vm0, %v3920_v0  ;;  %3353 = vmatpush3.msra.mxu0 %v3980_v16  ;;  %v4086_v6 = vld [vmem:[#allocation2 + $0x90] sm:$0xff]  ;;  %v4090_v8 = vld [vmem:[#allocation2 + $0x88] sm:$0xff] }
  0x18   :  { %3337 = vmatprep.mubr.msk.f32.mxu0 %vm80_vm1, %v72_v17  ;;  %3354 = vmatprep.subr.mxu0 %v3920_v0 }
  0x19   :  { %3338 = vmatmul.mubr.msk.f32.gmra.mxu0 %vm80_vm1, %v73_v18  ;;  %3368 = vmatpush3.msra.mxu1 %v4034_v37 }
  0x1a   :  { %3355 = vmatpush3.msra.mxu0 %v3990_v19  ;;  %3340 = vmatprep.mubr.msk.f32.mxu0 %vm80_vm1, %v74_v20 }
  0x1b   :  { %3356 = vmatprep.subr.mxu0 %v3920_v0  ;;  %3369 = vmatprep.subr.mxu1 %v3920_v0 }
  0x1c   :  { %3357 = vmatpush3.msra.mxu0 %v3997_v21  ;;  %3370 = vmatpush3.msra.mxu1 %v4038_v38 }
  0x1d   :  { %3358 = vmatprep.subr.mxu0 %v3920_v0  ;;  %3341 = vmatmul.mubr.msk.f32.gmra.mxu0 %vm80_vm1, %v75_v22 }
  0x1e   :  { %3359 = vmatpush3.msra.mxu0 %v4005_v23  ;;  %3364 = vmatprep.mubr.msk.f32.mxu0 %vm3921_vm0, %v3920_v0 }
  0x1f   :  { %3360 = vmatprep.subr.mxu0 %v3920_v0  ;;  %3374 = vmatprep.subr.mxu1 %v3920_v0 }
  0x20   :  { %3361 = vmatpush3.msra.mxu0 %v4010_v24 }
  0x21   :  { %3362 = vmatprep.subr.mxu0 %v3920_v0 }
  0x22   :  { %3363 = vmatpush3.msra.mxu0 %v4019_v27 }
  0x23   :  { %3393 = vmatprep.subr.mxu0 %v3920_v0 }
  0xd5   :  { %v3975_v9 = vpop.f32.mrf.mxu0  ;;  %v263_v10 = vpop.f32.mrf.mxu1 }
  0xd7   :  { %v165_v12 = vpop.f32.mrf.mxu0  ;;  %v3351_v13 = vpop.f32.mrf.mxu1 }
  0xd8   :  { %v166_v14 = vadd.f32 %v3977_v11, %v165_v12  ;;  %v4098_v12 = vld [vmem:[#allocation2 + $0xf0] sm:$0xff]  ;;  %v4102_v13 = vld [vmem:[#allocation2 + $0xe8] sm:$0xff] }
  0xd9   :  { %v4042_v39 = vpop.f32.mrf.mxu0 }
  0xda   :  { %v264_v15 = vadd.f32 %v263_v10, %v166_v14  ;;  %v4096_v10 = vld [vmem:[#allocation2 + $0xf8] sm:$0xff] }
  0xdb   :  { %v4044_v40 = vpop.f32.mrf.mxu0 }
  0xdc   :  { %3779 = vtanh.f32 %v264_v15  ;;  %v267_v26 = vmul.f32 0.5, %v264_v15 }
  0xdd   :  { %v4046_v41 = vpop.f32.mrf.mxu0 }
  0xde   :  { %3781 = vtanh.f32 %v267_v26  ;;  %v4130_v26 = vld [vmem:[#allocation2 + $0xd8] sm:$0xff] }
  0xdf   :  { %v4048_v42 = vpop.f32.mrf.mxu0 }
  0xe9   :  { %v3780_v25 = vpop.eup %3779 }
  0xea   :  { %274 = vrot.lane.b32.xlu0 %v3780_v25, %s3922_s0  ;;  %v4126_v25 = vld [vmem:[#allocation2 + $0xe0] sm:$0xff] }
  0xeb   :  { %v3782_v28 = vpop.eup %3781 }
  0xec   :  { %v269_v29 = vadd.f32 1.0, %v3782_v28  ;;  %v4133_v28 = vld [vmem:[#allocation2 + $0xd0] sm:$0xff] }
  0xee   :  { %v270_v30 = vmul.f32 0.5, %v269_v29  ;;  %v4138_v29 = vld [vmem:[#allocation2 + $0xc8] ss:$0 sm:$0xff] }
  0xf0   :  { %v272_v33 = vmul.f32 0.0, %v270_v30 }
 0x15c   :  { %v275_v31 = vpop.permute.xlu0 %274 }
 0x15d   :  { %v277_v32 = vmul.f32 %v275_v31, %v270_v30 }
 0x15f   :  { %279 = vrot.lane.b32.xlu0 %v277_v32, %s3923_s27 }
 0x1d1   :  { %v280_v34 = vpop.permute.xlu0 %279 }
 0x1d2   :  { %v4024_v35 = vadd.f32 %v280_v34, %v272_v33  ;;  %v171_v34 = vadd.f32 %v3975_v9, %v3977_v11 }
 0x1d4   :  { %v4028_v36 = vsel %vm80_vm1, 0.0, %v4024_v35  ;;  %3783 = vtanh.f32 %v4024_v35 }
 0x1d5   :  { %3365 = vmatmul.mubr.msk.f32.vlgmr.msra.gmra.mxu0 %vm294_vm2, %v4028_v36 }
 0x1d6   :  { %3405 = vmatprep.mubr.msk.f32.mxu0 %vm3921_vm0, %v3920_v0  ;;  %3394 = vmatpush3.msra.mxu0 %v4096_v10 }
 0x1d7   :  { %3395 = vmatprep.subr.mxu0 %v3920_v0 }
 0x1d8   :  { %3396 = vmatpush3.msra.mxu0 %v4098_v12 }
 0x1d9   :  { %3397 = vmatprep.subr.mxu0 %v3920_v0 }
 0x1da   :  { %3398 = vmatpush3.msra.mxu0 %v4102_v13 }
 0x1db   :  { %3399 = vmatprep.subr.mxu0 %v3920_v0 }
 0x1dc   :  { %3400 = vmatpush3.msra.mxu0 %v4126_v25 }
 0x1dd   :  { %3401 = vmatprep.subr.mxu0 %v3920_v0 }
 0x1de   :  { %3402 = vmatpush3.msra.mxu0 %v4130_v26 }
 0x1df   :  { %3403 = vmatprep.subr.mxu0 %v3920_v0 }
 0x1e0   :  { %3404 = vmatpush3.msra.mxu0 %v4133_v28 }
 0x1e1   :  { %v3784_v53 = vpop.eup %3783  ;;  %3417 = vmatprep.subr.mxu0 %v3920_v0 }
 0x295   :  { %v364_v44 = vpop.f32.mrf.mxu0 }
 0x296   :  { %v365_v45 = vadd.f32 %v4050_v43, %v364_v44 }
 0x297   :  { %v3366_v46 = vpop.f32.mrf.mxu0 }
 0x298   :  { %v368_v47 = vmax.f32 %v365_v45, 0.0 }
 0x29a   :  { %3372 = vmatmul.mubr.msk.f32.vlgmr.msra.gmra.mxu1 %vm373_vm3, %v368_v47 }
 0x29b   :  { %3390 = vmatprep.mubr.msk.f32.mxu1 %vm3921_vm0, %v3920_v0  ;;  %3375 = vmatpush3.msra.mxu1 %v4064_v61 }
 0x29c   :  { %3376 = vmatprep.subr.mxu1 %v3920_v0 }
 0x29d   :  { %3377 = vmatpush3.msra.mxu1 %v4066_v62 }
 0x29e   :  { %3378 = vmatprep.subr.mxu1 %v3920_v0 }
 0x29f   :  { %3379 = vmatpush3.msra.mxu1 %v4070_v63 }
 0x2a0   :  { %3380 = vmatprep.subr.mxu1 %v3920_v0 }
 0x2a1   :  { %3381 = vmatpush3.msra.mxu1 %v4074_v1 }
 0x2a2   :  { %3382 = vmatprep.subr.mxu1 %v3920_v0 }
 0x2a3   :  { %3383 = vmatpush3.msra.mxu1 %v4078_v2 }
 0x2a4   :  { %3384 = vmatprep.subr.mxu1 %v3920_v0 }
 0x2a5   :  { %3385 = vmatpush3.msra.mxu1 %v4082_v4 }
 0x2a6   :  { %3386 = vmatprep.subr.mxu1 %v3920_v0 }
 0x2a7   :  { %3387 = vmatpush3.msra.mxu1 %v4086_v6 }
 0x2a8   :  { %3388 = vmatprep.subr.mxu1 %v3920_v0 }
 0x2a9   :  { %3389 = vmatpush3.msra.mxu1 %v4090_v8 }
 0x2aa   :  { %3408 = vmatprep.subr.mxu1 %v3920_v0 }
 0x35a   :  { %v443_v49 = vpop.f32.mrf.mxu1 }
 0x35b   :  { %v444_v50 = vadd.f32 %v4056_v48, %v443_v49 }
 0x35c   :  { %v3373_v51 = vpop.f32.mrf.mxu1 }
 0x35d   :  { %v447_v52 = vsel %vm294_vm2, %v444_v50, -inf }
 0x35e   :  { %448 = vmax.xlane.f32.xlu1 %v447_v52 }
 0x36f   :  { %285 = vrot.lane.b32.xlu1 %v3784_v53, %s3924_s28  ;;  %v4165_v53 = vld [vmem:[#allocation2 + $0x100] ss:$0 sm:$0xff] }
 0x3e7   :  { %v449_v54 = vpop.xlane.xlu1 %448 }
 0x3e8   :  { %v450_v55 = vsub.f32 %v444_v50, %v449_v54 }
 0x3ea   :  { %v451_v56 = vmul.f32 1.442695, %v450_v55 }
 0x3eb   :  { %v286_v57 = vpop.permute.xlu1 %285 }
 0x3ec   :  { %3785 = vpow2.f32 %v451_v56  ;;  %v288_v58 = vmul.f32 %v286_v57, %v270_v30 }
 0x3ee   :  { %633 = vrot.lane.b32.xlu1 %v288_v58, %s3925_s29 }
 0x3f9   :  { %v3786_v59 = vpop.eup %3785 }
 0x3fa   :  { %v453_v60 = vsel %vm294_vm2, %v3786_v59, 0.0 }
 0x3fb   :  { %454 = vadd.xlane.f32.xlu0 %v453_v60 }
 0x460   :  { %v634_v22 = vpop.permute.xlu1 %633 }
 0x484   :  { %v455_v14 = vpop.xlane.xlu0 %454 }
 0x485   :  { %3787 = vrcp.f32 %v455_v14 }
 0x492   :  { %v3788_v15 = vpop.eup %3787 }
 0x493   :  { %v457_v17 = vmul.f32 %v3788_v15, %v3786_v59 }
 0x495   :  { %v458_v18 = vmul.f32 %v457_v17, %v4028_v36 }
 0x497   :  { %v459_v20 = vsel %vm294_vm2, %v458_v18, 0.0 }
 0x498   :  { %3391 = vmatmul.mubr.msk.f32.vlgmr.msra.gmra.mxu1 %vm464_vm4, %v459_v20 }
 0x499   :  { %3409 = vmatpush3.msra.mxu1 %v3951_v3  ;;  %3414 = vmatprep.mubr.msk.f32.mxu1 %vm3921_vm0, %v3920_v0 }
 0x49a   :  { %3410 = vmatprep.subr.mxu1 %v3920_v0 }
 0x49b   :  { %3411 = vmatpush3.msra.mxu1 %v3957_v5 }
 0x49c   :  { %3412 = vmatprep.subr.mxu1 %v3920_v0 }
 0x49d   :  { %3413 = vmatpush3.msra.mxu1 %v3961_v7 }
 0x49e   :  { %3415 = vmatmul.mubr.msk.f32.vlgmr.msra.gmra.mxu1 %vm80_vm1, %v634_v22  ;;  %3432 = vmatprep.subr.mxu1 %v3920_v0 }
 0x49f   :  { %3433 = vmatpush3.msra.mxu1 %v4034_v37  ;;  %3436 = vmatprep.mubr.msk.f32.mxu1 %vm3921_vm0, %v3920_v0 }
 0x4a0   :  { %3434 = vmatprep.subr.mxu1 %v3920_v0 }
 0x4a1   :  { %3435 = vmatpush3.msra.mxu1 %v4038_v38 }
 0x4a2   :  { %3439 = vmatprep.subr.mxu1 %v3920_v0 }
 0x558   :  { %v534_v30 = vpop.f32.mrf.mxu1 }
 0x559   :  { %v535_v31 = vadd.f32 %v4138_v29, %v534_v30 }
 0x55a   :  { %v3392_v32 = vpop.f32.mrf.mxu1 }
 0x55b   :  { %v538_v33 = vmax.f32 %v535_v31, 0.0 }
 0x55d   :  { %3406 = vmatmul.mubr.msk.f32.vlgmr.msra.gmra.mxu0 %vm294_vm2, %v538_v33 }
 0x55e   :  { %v703_v36 = vpop.f32.mrf.mxu1  ;;  %3418 = vmatpush3.msra.mxu0 %v3980_v16  ;;  %3429 = vmatprep.mubr.msk.f32.mxu0 %vm3921_vm0, %v3920_v0 }
 0x55f   :  { %v704_v44 = vadd.f32 %v703_v36, %v171_v34  ;;  %3419 = vmatprep.subr.mxu0 %v3920_v0 }
 0x560   :  { %v3416_v45 = vpop.f32.mrf.mxu1  ;;  %3420 = vmatpush3.msra.mxu0 %v3990_v19 }
 0x561   :  { %3789 = vtanh.f32 %v704_v44  ;;  %3421 = vmatprep.subr.mxu0 %v3920_v0  ;;  %v707_v46 = vmul.f32 0.5, %v704_v44 }
 0x562   :  { %3422 = vmatpush3.msra.mxu0 %v3997_v21 }
 0x563   :  { %3423 = vmatprep.subr.mxu0 %v3920_v0  ;;  %3791 = vtanh.f32 %v707_v46 }
 0x564   :  { %3424 = vmatpush3.msra.mxu0 %v4005_v23 }
 0x565   :  { %3425 = vmatprep.subr.mxu0 %v3920_v0 }
 0x566   :  { %3426 = vmatpush3.msra.mxu0 %v4010_v24 }
 0x567   :  { %3427 = vmatprep.subr.mxu0 %v3920_v0 }
 0x568   :  { %3428 = vmatpush3.msra.mxu0 %v4019_v27 }
 0x569   :  { %3458 = vmatprep.subr.mxu0 %v3920_v0 }
 0x56e   :  { %v3790_v9 = vpop.eup %3789 }
 0x56f   :  { %714 = vrot.lane.b32.xlu1 %v3790_v9, %s3922_s0 }
 0x570   :  { %v3792_v47 = vpop.eup %3791 }
 0x571   :  { %v709_v49 = vadd.f32 1.0, %v3792_v47 }
 0x573   :  { %v4159_v50 = vmul.f32 0.5, %v709_v49 }
 0x575   :  { %v712_v59 = vmul.f32 %v4159_v50, %v4024_v35 }
 0x5e1   :  { %v715_v51 = vpop.permute.xlu1 %714 }
 0x5e2   :  { %v717_v52 = vmul.f32 %v715_v51, %v4159_v50 }
 0x5e4   :  { %719 = vrot.lane.b32.xlu1 %v717_v52, %s3923_s27 }
 0x5e8   :  { %730 = vrot.lane.b32.xlu1 %v4024_v35, %s3926_s30 }
 0x61d   :  { %v612_v54 = vpop.f32.mrf.mxu0 }
 0x61e   :  { %v613_v55 = vadd.f32 %v4165_v53, %v612_v54 }
 0x61f   :  { %v3407_v56 = vpop.f32.mrf.mxu0 }
 0x620   :  { %3793 = vtanh.f32 %v613_v55  ;;  %v616_v35 = vmul.f32 0.5, %v613_v55 }
 0x622   :  { %3795 = vtanh.f32 %v616_v35 }
 0x62d   :  { %v3794_v57 = vpop.eup %3793 }
 0x62e   :  { %623 = vrot.lane.b32.xlu1 %v3794_v57, %s3927_s3 }
 0x62f   :  { %v3796_v17 = vpop.eup %3795 }
 0x630   :  { %v618_v18 = vadd.f32 1.0, %v3796_v17 }
 0x632   :  { %v619_v20 = vmul.f32 0.5, %v618_v18 }
 0x634   :  { %v621_v49 = vmul.f32 0.0, %v619_v20 }
 0x656   :  { %v720_v58 = vpop.permute.xlu1 %719 }
 0x657   :  { %v4171_v60 = vadd.f32 %v720_v58, %v712_v59 }
 0x659   :  { %3797 = vtanh.f32 %v4171_v60 }
 0x65a   :  { %v731_v14 = vpop.permute.xlu1 %730 }
 0x65b   :  { %v4175_v15 = vsel %vm80_vm1, %v731_v14, %v4171_v60 }
 0x65c   :  { %3430 = vmatmul.mubr.msk.f32.vlgmr.msra.gmra.mxu0 %vm294_vm2, %v4175_v15 }
 0x65d   :  { %3459 = vmatpush3.msra.mxu0 %v4096_v10  ;;  %3470 = vmatprep.mubr.msk.f32.mxu0 %vm3921_vm0, %v3920_v0 }
 0x65e   :  { %3460 = vmatprep.subr.mxu0 %v3920_v0 }
 0x65f   :  { %3461 = vmatpush3.msra.mxu0 %v4098_v12 }
 0x660   :  { %3462 = vmatprep.subr.mxu0 %v3920_v0 }
 0x661   :  { %3463 = vmatpush3.msra.mxu0 %v4102_v13 }
 0x662   :  { %3464 = vmatprep.subr.mxu0 %v3920_v0 }
 0x663   :  { %3465 = vmatpush3.msra.mxu0 %v4126_v25 }
 0x664   :  { %3466 = vmatprep.subr.mxu0 %v3920_v0 }
 0x665   :  { %3467 = vmatpush3.msra.mxu0 %v4130_v26 }
 0x666   :  { %3468 = vmatprep.subr.mxu0 %v3920_v0  ;;  %v3798_v46 = vpop.eup %3797 }
 0x667   :  { %3469 = vmatpush3.msra.mxu0 %v4133_v28 }
 0x668   :  { %3482 = vmatprep.subr.mxu0 %v3920_v0 }
 0x6a0   :  { %v624_v22 = vpop.permute.xlu1 %623 }
 0x6a1   :  { %v626_v30 = vmul.f32 %v624_v22, %v619_v20 }
 0x6a3   :  { %628 = vrot.lane.b32.xlu1 %v626_v30, %s3927_s3 }
 0x715   :  { %v629_v47 = vpop.permute.xlu1 %628 }
 0x716   :  { %v4218_v51 = vadd.f32 %v629_v47, %v621_v49 }
 0x71c   :  { %v803_v31 = vpop.f32.mrf.mxu0 }
 0x71d   :  { %v804_v32 = vadd.f32 %v4050_v43, %v803_v31 }
 0x71e   :  { %v3431_v33 = vpop.f32.mrf.mxu0 }
 0x71f   :  { %v807_v34 = vmax.f32 %v804_v32, 0.0  ;;  %v176_v33 = vadd.f32 %v3977_v11, %v4044_v40 }
 0x721   :  { %3437 = vmatmul.mubr.msk.f32.vlgmr.msra.gmra.mxu1 %vm373_vm3, %v807_v34 }
 0x722   :  { %3440 = vmatpush3.msra.mxu1 %v4064_v61  ;;  %3455 = vmatprep.mubr.msk.f32.mxu1 %vm3921_vm0, %v3920_v0 }
 0x723   :  { %3441 = vmatprep.subr.mxu1 %v3920_v0 }
 0x724   :  { %3442 = vmatpush3.msra.mxu1 %v4066_v62 }
 0x725   :  { %3443 = vmatprep.subr.mxu1 %v3920_v0 }
 0x726   :  { %3444 = vmatpush3.msra.mxu1 %v4070_v63 }
 0x727   :  { %3445 = vmatprep.subr.mxu1 %v3920_v0 }
 0x728   :  { %3446 = vmatpush3.msra.mxu1 %v4074_v1 }
 0x729   :  { %3447 = vmatprep.subr.mxu1 %v3920_v0 }
 0x72a   :  { %3448 = vmatpush3.msra.mxu1 %v4078_v2 }
 0x72b   :  { %3449 = vmatprep.subr.mxu1 %v3920_v0 }
 0x72c   :  { %3450 = vmatpush3.msra.mxu1 %v4082_v4 }
 0x72d   :  { %3451 = vmatprep.subr.mxu1 %v3920_v0 }
 0x72e   :  { %3452 = vmatpush3.msra.mxu1 %v4086_v6 }
 0x72f   :  { %3453 = vmatprep.subr.mxu1 %v3920_v0 }
 0x730   :  { %3454 = vmatpush3.msra.mxu1 %v4090_v8 }
 0x731   :  { %3473 = vmatprep.subr.mxu1 %v3920_v0 }
 0x7e1   :  { %v877_v36 = vpop.f32.mrf.mxu1 }
 0x7e2   :  { %v878_v44 = vadd.f32 %v4056_v48, %v877_v36 }
 0x7e3   :  { %v3438_v45 = vpop.f32.mrf.mxu1 }
 0x7e4   :  { %v881_v9 = vsel %vm294_vm2, %v878_v44, -inf }
 0x7e5   :  { %882 = vmax.xlane.f32.xlu0 %v881_v9 }
 0x7fb   :  { %725 = vrot.lane.b32.xlu0 %v3798_v46, %s3924_s28 }
 0x7ff   :  { %894 = vrot.lane.b32.xlu0 %v4218_v51, %s3924_s28 }
 0x86e   :  { %v883_v52 = vpop.xlane.xlu0 %882 }
 0x86f   :  { %v884_v54 = vsub.f32 %v878_v44, %v883_v52 }
 0x871   :  { %v885_v55 = vmul.f32 1.442695, %v884_v54 }
 0x872   :  { %v726_v56 = vpop.permute.xlu0 %725 }
 0x873   :  { %3799 = vpow2.f32 %v885_v55  ;;  %v728_v57 = vmul.f32 %v726_v56, %v4159_v50 }
 0x875   :  { %1062 = vrot.lane.b32.xlu0 %v728_v57, %s3925_s29 }
 0x876   :  { %v895_v20 = vpop.permute.xlu0 %894 }
 0x880   :  { %v3800_v58 = vpop.eup %3799 }
 0x881   :  { %v887_v59 = vsel %vm294_vm2, %v3800_v58, 0.0 }
 0x882   :  { %888 = vadd.xlane.f32.xlu1 %v887_v59 }
 0x8e7   :  { %v1063_v50 = vpop.permute.xlu0 %1062 }
 0x90b   :  { %v889_v14 = vpop.xlane.xlu1 %888 }
 0x90c   :  { %3801 = vrcp.f32 %v889_v14 }
 0x919   :  { %v3802_v35 = vpop.eup %3801 }
 0x91a   :  { %v891_v17 = vmul.f32 %v3802_v35, %v3800_v58 }
 0x91c   :  { %v892_v18 = vmul.f32 %v891_v17, %v4175_v15 }
 0x91e   :  { %v897_v22 = vsel %vm294_vm2, %v892_v18, %v895_v20 }
 0x91f   :  { %3456 = vmatmul.mubr.msk.f32.vlgmr.msra.gmra.mxu1 %vm464_vm4, %v897_v22 }
 0x920   :  { %3474 = vmatpush3.msra.mxu1 %v3951_v3  ;;  %3479 = vmatprep.mubr.msk.f32.mxu1 %vm3921_vm0, %v3920_v0 }
 0x921   :  { %3475 = vmatprep.subr.mxu1 %v3920_v0 }
 0x922   :  { %3476 = vmatpush3.msra.mxu1 %v3957_v5 }
 0x923   :  { %3477 = vmatprep.subr.mxu1 %v3920_v0 }
 0x924   :  { %3478 = vmatpush3.msra.mxu1 %v3961_v7 }
 0x925   :  { %3480 = vmatmul.mubr.msk.f32.vlgmr.msra.gmra.mxu1 %vm80_vm1, %v1063_v50  ;;  %3497 = vmatprep.subr.mxu1 %v3920_v0 }
 0x926   :  { %3498 = vmatpush3.msra.mxu1 %v4034_v37  ;;  %3501 = vmatprep.mubr.msk.f32.mxu1 %vm3921_vm0, %v3920_v0 }
 0x927   :  { %3499 = vmatprep.subr.mxu1 %v3920_v0 }
 0x928   :  { %3500 = vmatpush3.msra.mxu1 %v4038_v38 }
 0x929   :  { %3504 = vmatprep.subr.mxu1 %v3920_v0 }
 0x9df   :  { %v967_v15 = vpop.f32.mrf.mxu1 }
 0x9e0   :  { %v968_v30 = vadd.f32 %v4138_v29, %v967_v15 }
 0x9e1   :  { %v3457_v31 = vpop.f32.mrf.mxu1 }
 0x9e2   :  { %v971_v32 = vmax.f32 %v968_v30, 0.0 }
 0x9e4   :  { %3471 = vmatmul.mubr.msk.f32.vlgmr.msra.gmra.mxu0 %vm294_vm2, %v971_v32 }
 0x9e5   :  { %v1132_v34 = vpop.f32.mrf.mxu1  ;;  %3483 = vmatpush3.msra.mxu0 %v3980_v16  ;;  %3494 = vmatprep.mubr.msk.f32.mxu0 %vm3921_vm0, %v3920_v0 }
 0x9e6   :  { %v1133_v36 = vadd.f32 %v1132_v34, %v176_v33  ;;  %3484 = vmatprep.subr.mxu0 %v3920_v0 }
 0x9e7   :  { %v3481_v44 = vpop.f32.mrf.mxu1  ;;  %3485 = vmatpush3.msra.mxu0 %v3990_v19 }
 0x9e8   :  { %3803 = vtanh.f32 %v1133_v36  ;;  %3486 = vmatprep.subr.mxu0 %v3920_v0  ;;  %v1136_v45 = vmul.f32 0.5, %v1133_v36 }
 0x9e9   :  { %3487 = vmatpush3.msra.mxu0 %v3997_v21 }
 0x9ea   :  { %3488 = vmatprep.subr.mxu0 %v3920_v0  ;;  %3805 = vtanh.f32 %v1136_v45 }
 0x9eb   :  { %3489 = vmatpush3.msra.mxu0 %v4005_v23 }
 0x9ec   :  { %3490 = vmatprep.subr.mxu0 %v3920_v0 }
 0x9ed   :  { %3491 = vmatpush3.msra.mxu0 %v4010_v24 }
 0x9ee   :  { %3492 = vmatprep.subr.mxu0 %v3920_v0 }
 0x9ef   :  { %3493 = vmatpush3.msra.mxu0 %v4019_v27 }
 0x9f0   :  { %3523 = vmatprep.subr.mxu0 %v3920_v0 }
 0x9f5   :  { %v3804_v40 = vpop.eup %3803 }
 0x9f6   :  { %1143 = vrot.lane.b32.xlu0 %v3804_v40, %s3922_s0 }
 0x9f7   :  { %v3806_v9 = vpop.eup %3805 }
 0x9f8   :  { %v1138_v46 = vadd.f32 1.0, %v3806_v9 }
 0x9fa   :  { %v4262_v47 = vmul.f32 0.5, %v1138_v46 }
 0x9fc   :  { %v1141_v59 = vmul.f32 %v4262_v47, %v4171_v60 }
 0xa68   :  { %v1144_v49 = vpop.permute.xlu0 %1143 }
 0xa69   :  { %v1146_v52 = vmul.f32 %v1144_v49, %v4262_v47 }
 0xa6b   :  { %1148 = vrot.lane.b32.xlu0 %v1146_v52, %s3923_s27 }
 0xa6f   :  { %1159 = vrot.lane.b32.xlu0 %v4171_v60, %s3926_s30 }
 0xaa4   :  { %v1041_v54 = vpop.f32.mrf.mxu0 }
 0xaa5   :  { %v1042_v55 = vadd.f32 %v4165_v53, %v1041_v54 }
 0xaa6   :  { %v3472_v56 = vpop.f32.mrf.mxu0 }
 0xaa7   :  { %3807 = vtanh.f32 %v1042_v55  ;;  %v1045_v60 = vmul.f32 0.5, %v1042_v55 }
 0xaa9   :  { %3809 = vtanh.f32 %v1045_v60 }
 0xab4   :  { %v3808_v57 = vpop.eup %3807 }
 0xab5   :  { %1052 = vrot.lane.b32.xlu1 %v3808_v57, %s3927_s3 }
 0xab6   :  { %v3810_v18 = vpop.eup %3809 }
 0xab7   :  { %v1047_v20 = vadd.f32 1.0, %v3810_v18 }
 0xab9   :  { %v1048_v22 = vmul.f32 0.5, %v1047_v20 }
 0xabb   :  { %v1050_v9 = vmul.f32 %v1048_v22, %v4218_v51 }
 0xadd   :  { %v1149_v58 = vpop.permute.xlu0 %1148 }
 0xade   :  { %v4272_v14 = vadd.f32 %v1149_v58, %v1141_v59 }
 0xae0   :  { %3811 = vtanh.f32 %v4272_v14 }
 0xae1   :  { %v1160_v35 = vpop.permute.xlu0 %1159 }
 0xae2   :  { %v4276_v17 = vsel %vm80_vm1, %v1160_v35, %v4272_v14 }
 0xae3   :  { %3495 = vmatmul.mubr.msk.f32.vlgmr.msra.gmra.mxu0 %vm294_vm2, %v4276_v17 }
 0xae4   :  { %3524 = vmatpush3.msra.mxu0 %v4096_v10  ;;  %3535 = vmatprep.mubr.msk.f32.mxu0 %vm3921_vm0, %v3920_v0 }
 0xae5   :  { %3525 = vmatprep.subr.mxu0 %v3920_v0 }
 0xae6   :  { %3526 = vmatpush3.msra.mxu0 %v4098_v12 }
 0xae7   :  { %3527 = vmatprep.subr.mxu0 %v3920_v0 }
 0xae8   :  { %3528 = vmatpush3.msra.mxu0 %v4102_v13 }
 0xae9   :  { %3529 = vmatprep.subr.mxu0 %v3920_v0 }
 0xaea   :  { %3530 = vmatpush3.msra.mxu0 %v4126_v25 }
 0xaeb   :  { %3531 = vmatprep.subr.mxu0 %v3920_v0 }
 0xaec   :  { %3532 = vmatpush3.msra.mxu0 %v4130_v26 }
 0xaed   :  { %3533 = vmatprep.subr.mxu0 %v3920_v0  ;;  %v3812_v49 = vpop.eup %3811 }
 0xaee   :  { %3534 = vmatpush3.msra.mxu0 %v4133_v28 }
 0xaef   :  { %3538 = vmatprep.subr.mxu0 %v3920_v0 }
 0xb27   :  { %v1053_v50 = vpop.permute.xlu1 %1052 }
 0xb28   :  { %v1055_v15 = vmul.f32 %v1053_v50, %v1048_v22 }
 0xb2a   :  { %1057 = vrot.lane.b32.xlu1 %v1055_v15, %s3927_s3 }
 0xb9c   :  { %v1058_v45 = vpop.permute.xlu1 %1057 }
 0xb9d   :  { %v4319_v46 = vadd.f32 %v1058_v45, %v1050_v9 }
 0xba3   :  { %v1232_v30 = vpop.f32.mrf.mxu0 }
 0xba4   :  { %v1233_v31 = vadd.f32 %v4050_v43, %v1232_v30 }
 0xba5   :  { %v3496_v32 = vpop.f32.mrf.mxu0 }
 0xba6   :  { %v1236_v33 = vmax.f32 %v1233_v31, 0.0 }
 0xba8   :  { %3502 = vmatmul.mubr.msk.f32.vlgmr.msra.gmra.mxu1 %vm373_vm3, %v1236_v33 }
 0xba9   :  { %3505 = vmatpush3.msra.mxu1 %v4064_v61  ;;  %3520 = vmatprep.mubr.msk.f32.mxu1 %vm3921_vm0, %v3920_v0 }
 0xbaa   :  { %3506 = vmatprep.subr.mxu1 %v3920_v0 }
 0xbab   :  { %3507 = vmatpush3.msra.mxu1 %v4066_v62 }
 0xbac   :  { %3508 = vmatprep.subr.mxu1 %v3920_v0 }
 0xbad   :  { %3509 = vmatpush3.msra.mxu1 %v4070_v63 }
 0xbae   :  { %3510 = vmatprep.subr.mxu1 %v3920_v0 }
 0xbaf   :  { %3511 = vmatpush3.msra.mxu1 %v4074_v1 }
 0xbb0   :  { %3512 = vmatprep.subr.mxu1 %v3920_v0 }
 0xbb1   :  { %3513 = vmatpush3.msra.mxu1 %v4078_v2 }
 0xbb2   :  { %3514 = vmatprep.subr.mxu1 %v3920_v0 }
 0xbb3   :  { %3515 = vmatpush3.msra.mxu1 %v4082_v4 }
 0xbb4   :  { %3516 = vmatprep.subr.mxu1 %v3920_v0 }
 0xbb5   :  { %3517 = vmatpush3.msra.mxu1 %v4086_v6 }
 0xbb6   :  { %3518 = vmatprep.subr.mxu1 %v3920_v0 }
 0xbb7   :  { %3519 = vmatpush3.msra.mxu1 %v4090_v8 }
 0xbb8   :  { %3547 = vmatprep.subr.mxu1 %v3920_v0 }
 0xc68   :  { %v1306_v34 = vpop.f32.mrf.mxu1 }
 0xc69   :  { %v1307_v36 = vadd.f32 %v4056_v48, %v1306_v34 }
 0xc6a   :  { %v3503_v44 = vpop.f32.mrf.mxu1 }
 0xc6b   :  { %v1310_v40 = vsel %vm294_vm2, %v1307_v36, -inf }
 0xc6c   :  { %1311 = vmax.xlane.f32.xlu0 %v1310_v40 }
 0xc82   :  { %1323 = vrot.lane.b32.xlu0 %v4319_v46, %s3924_s28 }
 0xc86   :  { %1154 = vrot.lane.b32.xlu0 %v3812_v49, %s3924_s28 }
 0xcf5   :  { %v1312_v52 = vpop.xlane.xlu0 %1311 }
 0xcf6   :  { %v1313_v54 = vsub.f32 %v1307_v36, %v1312_v52 }
 0xcf8   :  { %v1314_v55 = vmul.f32 1.442695, %v1313_v54 }
 0xcf9   :  { %v1324_v58 = vpop.permute.xlu0 %1323 }
 0xcfa   :  { %3813 = vpow2.f32 %v1314_v55 }
 0xcfd   :  { %v1155_v59 = vpop.permute.xlu0 %1154 }
 0xcfe   :  { %v1157_v51 = vmul.f32 %v1155_v59, %v4262_v47 }
 0xd07   :  { %v3814_v56 = vpop.eup %3813 }
 0xd08   :  { %v1316_v57 = vsel %vm294_vm2, %v3814_v56, 0.0 }
 0xd09   :  { %1317 = vadd.xlane.f32.xlu1 %v1316_v57 }
 0xd1a   :  { %1491 = vrot.lane.b32.xlu1 %v1157_v51, %s3925_s29 }
 0xd92   :  { %v1318_v35 = vpop.xlane.xlu1 %1317 }
 0xd93   :  { %3815 = vrcp.f32 %v1318_v35 }
 0xda0   :  { %v3816_v60 = vpop.eup %3815 }
 0xda1   :  { %v1320_v18 = vmul.f32 %v3816_v60, %v3814_v56 }
 0xda3   :  { %v1321_v20 = vmul.f32 %v1320_v18, %v4276_v17 }
 0xda5   :  { %v1326_v22 = vsel %vm294_vm2, %v1321_v20, %v1324_v58 }
 0xda6   :  { %3521 = vmatmul.mubr.msk.f32.vlgmr.msra.gmra.mxu1 %vm464_vm4, %v1326_v22 }
 0xda7   :  { %3548 = vmatpush3.msra.mxu1 %v3980_v16  ;;  %3559 = vmatprep.mubr.msk.f32.mxu1 %vm3921_vm0, %v3920_v0 }
 0xda8   :  { %3549 = vmatprep.subr.mxu1 %v3920_v0 }
 0xda9   :  { %3550 = vmatpush3.msra.mxu1 %v3990_v19 }
 0xdaa   :  { %3551 = vmatprep.subr.mxu1 %v3920_v0 }
 0xdab   :  { %3552 = vmatpush3.msra.mxu1 %v3997_v21  ;;  %v1492_v21 = vpop.permute.xlu1 %1491 }
 0xdac   :  { %3553 = vmatprep.subr.mxu1 %v3920_v0 }
 0xdad   :  { %3554 = vmatpush3.msra.mxu1 %v4005_v23 }
 0xdae   :  { %3555 = vmatprep.subr.mxu1 %v3920_v0 }
 0xdaf   :  { %3556 = vmatpush3.msra.mxu1 %v4010_v24 }
 0xdb0   :  { %3557 = vmatprep.subr.mxu1 %v3920_v0 }
 0xdb1   :  { %3558 = vmatpush3.msra.mxu1 %v4019_v27 }
 0xdb2   :  { %3588 = vmatprep.subr.mxu1 %v3920_v0 }
 0xe66   :  { %v1396_v16 = vpop.f32.mrf.mxu1 }
 0xe67   :  { %v1397_v19 = vadd.f32 %v4138_v29, %v1396_v16 }
 0xe68   :  { %v3522_v47 = vpop.f32.mrf.mxu1 }
 0xe69   :  { %v1400_v17 = vmax.f32 %v1397_v19, 0.0 }
 0xe6b   :  { %3536 = vmatmul.mubr.msk.f32.vlgmr.msra.gmra.mxu0 %vm294_vm2, %v1400_v17  ;;  %v4432_v17 = vld [vmem:[#allocation2 + $0x60] sm:$0xff] }
 0xe6c   :  { %3539 = vmatpush3.msra.mxu0 %v3951_v3  ;;  %3544 = vmatprep.mubr.msk.f32.mxu0 %vm3921_vm0, %v3920_v0 }
 0xe6d   :  { %3540 = vmatprep.subr.mxu0 %v3920_v0 }
 0xe6e   :  { %3541 = vmatpush3.msra.mxu0 %v3957_v5 }
 0xe6f   :  { %3542 = vmatprep.subr.mxu0 %v3920_v0 }
 0xe70   :  { %3543 = vmatpush3.msra.mxu0 %v3961_v7  ;;  %v181_v7 = vadd.f32 %v4042_v39, %v3977_v11 }
 0xe71   :  { %3545 = vmatmul.mubr.msk.f32.vlgmr.msra.gmra.mxu0 %vm80_vm1, %v1492_v21  ;;  %3562 = vmatprep.subr.mxu0 %v3920_v0  ;;  %v4438_v21 = vld [vmem:[#allocation2 + $0x58] sm:$0xff] }
 0xe72   :  { %3563 = vmatpush3.msra.mxu0 %v4034_v37  ;;  %3566 = vmatprep.mubr.msk.f32.mxu0 %vm3921_vm0, %v3920_v0 }
 0xe73   :  { %3564 = vmatprep.subr.mxu0 %v3920_v0 }
 0xe74   :  { %3565 = vmatpush3.msra.mxu0 %v4038_v38 }
 0xe75   :  { %3569 = vmatprep.subr.mxu0 %v3920_v0 }
 0xf2b   :  { %v1470_v3 = vpop.f32.mrf.mxu0 }
 0xf2c   :  { %v1471_v30 = vadd.f32 %v4165_v53, %v1470_v3  ;;  %v4442_v3 = vld [vmem:[#allocation2 + $0x50] sm:$0xff] }
 0xf2d   :  { %v3537_v5 = vpop.f32.mrf.mxu0 }
 0xf2e   :  { %v1474_v39 = vmul.f32 0.5, %v1471_v30  ;;  %v4446_v5 = vld [vmem:[#allocation2 + $0x48] sm:$0xff] }
 0xf31   :  { %v1561_v23 = vpop.f32.mrf.mxu0 }
 0xf32   :  { %v1562_v24 = vadd.f32 %v1561_v23, %v181_v7  ;;  %v4450_v7 = vld [vmem:[#allocation2 + $0x40] sm:$0xff]  ;;  %v4454_v23 = vld [vmem:[#allocation2 + $0x38] sm:$0xff] }
 0xf33   :  { %v3546_v27 = vpop.f32.mrf.mxu0 }
 0xf34   :  { %3817 = vtanh.f32 %v1562_v24  ;;  %v1565_v37 = vmul.f32 0.5, %v1562_v24 }
 0xf36   :  { %3819 = vtanh.f32 %v1565_v37 }
 0xf37   :  { %3821 = vtanh.f32 %v1471_v30  ;;  %v4466_v30 = vld [vmem:[#allocation2 + $0x20] sm:$0xff] }
 0xf38   :  { %3823 = vtanh.f32 %v1474_v39  ;;  %v4485_v39 = vld [vmem:[#allocation2 + $0x30] ss:$0 sm:$0xff] }
 0xf41   :  { %v3818_v50 = vpop.eup %3817 }
 0xf42   :  { %1572 = vrot.lane.b32.xlu0 %v3818_v50, %s3922_s0 }
 0xf43   :  { %v3820_v15 = vpop.eup %3819 }
 0xf44   :  { %v1567_v38 = vadd.f32 1.0, %v3820_v15  ;;  %v3822_v11 = vpop.eup %3821  ;;  %v4460_v15 = vld [vmem:[#allocation2 + $0x28] sm:$0xff] }
 0xf45   :  { %v3824_v34 = vpop.eup %3823 }
 0xf46   :  { %v4365_v31 = vmul.f32 0.5, %v1567_v38  ;;  %v1476_v45 = vadd.f32 1.0, %v3824_v34  ;;  %v4470_v38 = vld [vmem:[#allocation2 + $0x18] sm:$0xff]  ;;  %v186_v34 = vadd.f32 %v4485_v39, %v4048_v42 }
 0xf48   :  { %v1570_v44 = vmul.f32 %v4365_v31, %v4272_v14  ;;  %v1477_v52 = vmul.f32 0.5, %v1476_v45 }
 0xfb4   :  { %v1573_v32 = vpop.permute.xlu0 %1572 }
 0xfb5   :  { %v1575_v33 = vmul.f32 %v1573_v32, %v4365_v31  ;;  %v4481_v32 = vld [vmem:[#allocation2 + $0x70] sm:$0xff] }
 0xfb7   :  { %1577 = vrot.lane.b32.xlu0 %v1575_v33, %s3923_s27 }
 0xfbb   :  { %1588 = vrot.lane.b32.xlu0 %v4272_v14, %s3926_s30 }
 0xfbf   :  { %1481 = vrot.lane.b32.xlu0 %v3822_v11, %s3927_s3 }
0x1029   :  { %v1578_v36 = vpop.permute.xlu0 %1577 }
0x102a   :  { %v4374_v40 = vadd.f32 %v1578_v36, %v1570_v44 }
0x102d   :  { %v1589_v9 = vpop.permute.xlu0 %1588 }
0x102e   :  { %v4378_v49 = vsel %vm80_vm1, %v1589_v9, %v4374_v40 }
0x102f   :  { %3560 = vmatmul.mubr.msk.f32.vlgmr.msra.gmra.mxu1 %vm294_vm2, %v4378_v49 }
0x1030   :  { %3589 = vmatpush3.msra.mxu1 %v4096_v10  ;;  %3600 = vmatprep.mubr.msk.f32.mxu1 %vm3921_vm0, %v3920_v0 }
0x1031   :  { %v1482_v54 = vpop.permute.xlu0 %1481  ;;  %3590 = vmatprep.subr.mxu1 %v3920_v0 }
0x1032   :  { %v1484_v14 = vmul.f32 %v1482_v54, %v1477_v52  ;;  %3591 = vmatpush3.msra.mxu1 %v4098_v12 }
0x1033   :  { %3592 = vmatprep.subr.mxu1 %v3920_v0 }
0x1034   :  { %1486 = vrot.lane.b32.xlu0 %v1484_v14, %s3927_s3  ;;  %3593 = vmatpush3.msra.mxu1 %v4102_v13 }
0x1035   :  { %3594 = vmatprep.subr.mxu1 %v3920_v0 }
0x1036   :  { %3595 = vmatpush3.msra.mxu1 %v4126_v25 }
0x1037   :  { %3596 = vmatprep.subr.mxu1 %v3920_v0 }
0x1038   :  { %3597 = vmatpush3.msra.mxu1 %v4130_v26 }
0x1039   :  { %3598 = vmatprep.subr.mxu1 %v3920_v0 }
0x103a   :  { %3599 = vmatpush3.msra.mxu1 %v4133_v28 }
0x103b   :  { %3603 = vmatprep.subr.mxu1 %v3920_v0 }
0x10ef   :  { %v1661_v55 = vpop.f32.mrf.mxu1 }
0x10f0   :  { %v1662_v56 = vadd.f32 %v4050_v43, %v1661_v55 }
0x10f1   :  { %v3561_v57 = vpop.f32.mrf.mxu1 }
0x10f2   :  { %v1665_v58 = vmax.f32 %v1662_v56, 0.0 }
0x10f4   :  { %3567 = vmatmul.mubr.msk.f32.vlgmr.msra.gmra.mxu0 %vm373_vm3, %v1665_v58 }
0x10f5   :  { %3570 = vmatpush3.msra.mxu0 %v4064_v61  ;;  %3585 = vmatprep.mubr.msk.f32.mxu0 %vm3921_vm0, %v3920_v0 }
0x10f6   :  { %3571 = vmatprep.subr.mxu0 %v3920_v0 }
0x10f7   :  { %3572 = vmatpush3.msra.mxu0 %v4066_v62 }
0x10f8   :  { %3573 = vmatprep.subr.mxu0 %v3920_v0 }
0x10f9   :  { %3574 = vmatpush3.msra.mxu0 %v4070_v63 }
0x10fa   :  { %3575 = vmatprep.subr.mxu0 %v3920_v0 }
0x10fb   :  { %3576 = vmatpush3.msra.mxu0 %v4074_v1  ;;  %v1487_v1 = vpop.permute.xlu0 %1486 }
0x10fc   :  { %3577 = vmatprep.subr.mxu0 %v3920_v0 }
0x10fd   :  { %3578 = vmatpush3.msra.mxu0 %v4078_v2  ;;  %v1479_v2 = vmul.f32 %v1477_v52, %v4319_v46 }
0x10fe   :  { %3579 = vmatprep.subr.mxu0 %v3920_v0 }
0x10ff   :  { %3580 = vmatpush3.msra.mxu0 %v4082_v4  ;;  %v4420_v4 = vadd.f32 %v1487_v1, %v1479_v2 }
0x1100   :  { %3581 = vmatprep.subr.mxu0 %v3920_v0 }
0x1101   :  { %3582 = vmatpush3.msra.mxu0 %v4086_v6 }
0x1102   :  { %3583 = vmatprep.subr.mxu0 %v3920_v0 }
0x1103   :  { %3584 = vmatpush3.msra.mxu0 %v4090_v8 }
0x1104   :  { %3612 = vmatprep.subr.mxu0 %v3920_v0 }
0x11b4   :  { %v1735_v43 = vpop.f32.mrf.mxu0 }
0x11b5   :  { %v1736_v61 = vadd.f32 %v4056_v48, %v1735_v43 }
0x11b6   :  { %v3568_v62 = vpop.f32.mrf.mxu0 }
0x11b7   :  { %v1739_v63 = vsel %vm294_vm2, %v1736_v61, -inf }
0x11b8   :  { %1740 = vmax.xlane.f32.xlu1 %v1739_v63 }
0x11c9   :  { %1752 = vrot.lane.b32.xlu1 %v4420_v4, %s3924_s28 }
0x1241   :  { %v1741_v6 = vpop.xlane.xlu1 %1740 }
0x1242   :  { %v1742_v59 = vsub.f32 %v1736_v61, %v1741_v6 }
0x1244   :  { %v1743_v8 = vmul.f32 1.442695, %v1742_v59 }
0x1245   :  { %v1753_v19 = vpop.permute.xlu1 %1752 }
0x1246   :  { %3825 = vpow2.f32 %v1743_v8 }
0x1247   :  { %3827 = vtanh.f32 %v4374_v40 }
0x1253   :  { %v3826_v51 = vpop.eup %3825 }
0x1254   :  { %v1745_v35 = vsel %vm294_vm2, %v3826_v51, 0.0  ;;  %v3828_v48 = vpop.eup %3827 }
0x1255   :  { %1746 = vadd.xlane.f32.xlu0 %v1745_v35  ;;  %v4541_v35 = vld [vmem:[#allocation2 + $0xa8] sm:$0xff] }
0x126b   :  { %1583 = vrot.lane.b32.xlu0 %v3828_v48, %s3924_s28  ;;  %v4545_v48 = vld [vmem:[#allocation2 + $0xa0] sm:$0xff] }
0x12de   :  { %v1747_v60 = vpop.xlane.xlu0 %1746 }
0x12df   :  { %3829 = vrcp.f32 %v1747_v60  ;;  %v4549_v60 = vld [vmem:[#allocation2 + $0x98] sm:$0xff] }
0x12e2   :  { %v1584_v46 = vpop.permute.xlu0 %1583 }
0x12e3   :  { %v1586_v18 = vmul.f32 %v1584_v46, %v4365_v31  ;;  %v4475_v31 = vld [vmem:[#allocation2 + $0x78] sm:$0xff]  ;;  %v4553_v46 = vld [vmem:[#allocation2 + $0x90] sm:$0xff] }
0x12e5   :  { %1920 = vrot.lane.b32.xlu1 %v1586_v18, %s3925_s29  ;;  %v4557_v18 = vld [vmem:[#allocation2 + $0x88] sm:$0xff] }
0x12ec   :  { %v3830_v20 = vpop.eup %3829 }
0x12ed   :  { %v1749_v22 = vmul.f32 %v3830_v20, %v3826_v51 }
0x12ef   :  { %v1750_v16 = vmul.f32 %v1749_v22, %v4378_v49  ;;  %v4561_v22 = vld [vmem:[#allocation2 + $0x80] ss:$0 sm:$0xff] }
0x12f1   :  { %v1755_v47 = vsel %vm294_vm2, %v1750_v16, %v1753_v19 }
0x12f2   :  { %3586 = vmatmul.mubr.msk.f32.vlgmr.msra.gmra.mxu0 %vm464_vm4, %v1755_v47 }
0x12f3   :  { %3613 = vmatpush3.msra.mxu0 %v4432_v17  ;;  %3624 = vmatprep.mubr.msk.f32.mxu0 %vm3921_vm0, %v3920_v0 }
0x12f4   :  { %3614 = vmatprep.subr.mxu0 %v3920_v0 }
0x12f5   :  { %3615 = vmatpush3.msra.mxu0 %v4438_v21 }
0x12f6   :  { %3616 = vmatprep.subr.mxu0 %v3920_v0 }
0x12f7   :  { %3617 = vmatpush3.msra.mxu0 %v4442_v3 }
0x12f8   :  { %3618 = vmatprep.subr.mxu0 %v3920_v0 }
0x12f9   :  { %3619 = vmatpush3.msra.mxu0 %v4446_v5 }
0x12fa   :  { %3620 = vmatprep.subr.mxu0 %v3920_v0 }
0x12fb   :  { %3621 = vmatpush3.msra.mxu0 %v4450_v7 }
0x12fc   :  { %3622 = vmatprep.subr.mxu0 %v3920_v0 }
0x12fd   :  { %3623 = vmatpush3.msra.mxu0 %v4454_v23 }
0x12fe   :  { %3653 = vmatprep.subr.mxu0 %v3920_v0 }
0x13b2   :  { %v1825_v24 = vpop.f32.mrf.mxu0 }
0x13b3   :  { %v1826_v27 = vadd.f32 %v4138_v29, %v1825_v24  ;;  %v1921_v29 = vpop.permute.xlu1 %1920 }
0x13b4   :  { %v3587_v50 = vpop.f32.mrf.mxu0 }
0x13b5   :  { %v1829_v37 = vmax.f32 %v1826_v27, 0.0 }
0x13b7   :  { %3601 = vmatmul.mubr.msk.f32.vlgmr.msra.gmra.mxu1 %vm294_vm2, %v1829_v37 }
0x13b8   :  { %3604 = vmatpush3.msra.mxu1 %v4460_v15  ;;  %3609 = vmatprep.mubr.msk.f32.mxu1 %vm3921_vm0, %v3920_v0 }
0x13b9   :  { %3605 = vmatprep.subr.mxu1 %v3920_v0 }
0x13ba   :  { %3606 = vmatpush3.msra.mxu1 %v4466_v30 }
0x13bb   :  { %3607 = vmatprep.subr.mxu1 %v3920_v0 }
0x13bc   :  { %3608 = vmatpush3.msra.mxu1 %v4470_v38 }
0x13bd   :  { %3610 = vmatmul.mubr.msk.f32.vlgmr.msra.gmra.mxu1 %vm80_vm1, %v1921_v29  ;;  %3627 = vmatprep.subr.mxu1 %v3920_v0 }
0x13be   :  { %3628 = vmatpush3.msra.mxu1 %v4475_v31  ;;  %3631 = vmatprep.mubr.msk.f32.mxu1 %vm3921_vm0, %v3920_v0 }
0x13bf   :  { %3629 = vmatprep.subr.mxu1 %v3920_v0 }
0x13c0   :  { %3630 = vmatpush3.msra.mxu1 %v4481_v32 }
0x13c1   :  { %3634 = vmatprep.subr.mxu1 %v3920_v0 }
0x1477   :  { %v1899_v33 = vpop.f32.mrf.mxu1 }
0x1478   :  { %v1900_v52 = vadd.f32 %v4165_v53, %v1899_v33 }
0x1479   :  { %v3602_v11 = vpop.f32.mrf.mxu1 }
0x147a   :  { %v1903_v58 = vmul.f32 0.5, %v1900_v52 }
0x147d   :  { %v1990_v36 = vpop.f32.mrf.mxu1 }
0x147e   :  { %v1991_v44 = vadd.f32 %v1990_v36, %v186_v34 }
0x147f   :  { %v3611_v45 = vpop.f32.mrf.mxu1 }
0x1480   :  { %3831 = vtanh.f32 %v1991_v44  ;;  %v1994_v49 = vmul.f32 0.5, %v1991_v44 }
0x1482   :  { %3833 = vtanh.f32 %v1994_v49 }
0x1483   :  { %3835 = vtanh.f32 %v1900_v52 }
0x1484   :  { %3837 = vtanh.f32 %v1903_v58 }
0x148d   :  { %v3832_v9 = vpop.eup %3831 }
0x148e   :  { %2001 = vrot.lane.b32.xlu1 %v3832_v9, %s3922_s0 }
0x148f   :  { %v3834_v54 = vpop.eup %3833 }
0x1490   :  { %v1996_v14 = vadd.f32 1.0, %v3834_v54  ;;  %v3836_v57 = vpop.eup %3835 }
0x1491   :  { %v3838_v43 = vpop.eup %3837 }
0x1492   :  { %2017 = vrot.lane.b32.xlu1 %v4374_v40, %s3926_s30  ;;  %v4493_v55 = vmul.f32 0.5, %v1996_v14  ;;  %v1905_v53 = vadd.f32 1.0, %v3838_v43 }
0x1494   :  { %v1999_v61 = vmul.f32 %v4493_v55, %v4374_v40  ;;  %v1906_v2 = vmul.f32 0.5, %v1905_v53 }
0x1496   :  { %v1908_v27 = vmul.f32 %v1906_v2, %v4420_v4 }
0x1500   :  { %v2002_v42 = vpop.permute.xlu1 %2001 }
0x1501   :  { %v2004_v56 = vmul.f32 %v2002_v42, %v4493_v55 }
0x1503   :  { %2006 = vrot.lane.b32.xlu0 %v2004_v56, %s3923_s27 }
0x1504   :  { %v2018_v1 = vpop.permute.xlu1 %2017 }
0x1507   :  { %1910 = vrot.lane.b32.xlu0 %v3836_v57, %s3927_s3 }
0x1575   :  { %v2007_v62 = vpop.permute.xlu0 %2006 }
0x1576   :  { %v4500_v63 = vadd.f32 %v2007_v62, %v1999_v61 }
0x1578   :  { %v4504_v6 = vsel %vm80_vm1, %v2018_v1, %v4500_v63 }
0x1579   :  { %v1911_v59 = vpop.permute.xlu0 %1910  ;;  %3625 = vmatmul.mubr.msk.f32.vlgmr.msra.gmra.mxu0 %vm294_vm2, %v4504_v6 }
0x157a   :  { %v1913_v8 = vmul.f32 %v1911_v59, %v1906_v2  ;;  %3654 = vmatpush3.msra.mxu0 %v4096_v10  ;;  %3665 = vmatprep.mubr.msk.f32.mxu0 %vm3921_vm0, %v3920_v0 }
0x157b   :  { %3655 = vmatprep.subr.mxu0 %v3920_v0 }
0x157c   :  { %1915 = vrot.lane.b32.xlu0 %v1913_v8, %s3927_s3  ;;  %3656 = vmatpush3.msra.mxu0 %v4098_v12  ;;  %v4523_v12 = vld [vmem:[#allocation2 + $0x68] ss:$0 sm:$0xff] }
0x157d   :  { %3657 = vmatprep.subr.mxu0 %v3920_v0 }
0x157e   :  { %3658 = vmatpush3.msra.mxu0 %v4102_v13 }
0x157f   :  { %3659 = vmatprep.subr.mxu0 %v3920_v0 }
0x1580   :  { %3660 = vmatpush3.msra.mxu0 %v4126_v25  ;;  %v4527_v25 = vld [vmem:[#allocation2 + $0xc0] sm:$0xff] }
0x1581   :  { %3661 = vmatprep.subr.mxu0 %v3920_v0 }
0x1582   :  { %3662 = vmatpush3.msra.mxu0 %v4130_v26  ;;  %v4533_v26 = vld [vmem:[#allocation2 + $0xb8] sm:$0xff] }
0x1583   :  { %3663 = vmatprep.subr.mxu0 %v3920_v0 }
0x1584   :  { %3664 = vmatpush3.msra.mxu0 %v4133_v28  ;;  %v4537_v28 = vld [vmem:[#allocation2 + $0xb0] sm:$0xff] }
0x1585   :  { %3668 = vmatprep.subr.mxu0 %v3920_v0 }
0x15ee   :  { %v1916_v24 = vpop.permute.xlu0 %1915 }
0x15ef   :  { %v4566_v50 = vadd.f32 %v1916_v24, %v1908_v27  ;;  %v3892_v24 = vld [vmem:[#allocation2 + $0xe0] sm:$0xff]  ;;  %v3893_v27 = vld [vmem:[#allocation2 + $0xd8] sm:$0xff] }
0x1639   :  { %v2090_v10 = vpop.f32.mrf.mxu0 }
0x163a   :  { %v2091_v40 = vadd.f32 %v4523_v12, %v2090_v10 }
0x163b   :  { %v3626_v13 = vpop.f32.mrf.mxu0 }
0x163c   :  { %v2094_v51 = vmax.f32 %v2091_v40, 0.0 }
0x163e   :  { %3632 = vmatmul.mubr.msk.f32.vlgmr.msra.gmra.mxu1 %vm373_vm3, %v2094_v51 }
0x163f   :  { %3635 = vmatpush3.msra.mxu1 %v4527_v25  ;;  %3650 = vmatprep.mubr.msk.f32.mxu1 %vm3921_vm0, %v3920_v0 }
0x1640   :  { %3636 = vmatprep.subr.mxu1 %v3920_v0 }
0x1641   :  { %3637 = vmatpush3.msra.mxu1 %v4533_v26 }
0x1642   :  { %3638 = vmatprep.subr.mxu1 %v3920_v0 }
0x1643   :  { %3639 = vmatpush3.msra.mxu1 %v4537_v28 }
0x1644   :  { %3640 = vmatprep.subr.mxu1 %v3920_v0 }
0x1645   :  { %3641 = vmatpush3.msra.mxu1 %v4541_v35 }
0x1646   :  { %3642 = vmatprep.subr.mxu1 %v3920_v0 }
0x1647   :  { %3643 = vmatpush3.msra.mxu1 %v4545_v48 }
0x1648   :  { %3644 = vmatprep.subr.mxu1 %v3920_v0 }
0x1649   :  { %3645 = vmatpush3.msra.mxu1 %v4549_v60 }
0x164a   :  { %3646 = vmatprep.subr.mxu1 %v3920_v0 }
0x164b   :  { %3647 = vmatpush3.msra.mxu1 %v4553_v46 }
0x164c   :  { %3648 = vmatprep.subr.mxu1 %v3920_v0 }
0x164d   :  { %3649 = vmatpush3.msra.mxu1 %v4557_v18 }
0x164e   :  { %3677 = vmatprep.subr.mxu1 %v3920_v0 }
0x16fe   :  { %v2164_v20 = vpop.f32.mrf.mxu1 }
0x16ff   :  { %v2165_v16 = vadd.f32 %v4561_v22, %v2164_v20 }
0x1700   :  { %v3633_v19 = vpop.f32.mrf.mxu1 }
0x1701   :  { %v2168_v47 = vsel %vm294_vm2, %v2165_v16, -inf  ;;  %v3889_v19 = vld [vmem:[#allocation2 + $0xf8] sm:$0xff] }
0x1702   :  { %2169 = vmax.xlane.f32.xlu1 %v2168_v47  ;;  %v3891_v47 = vld [vmem:[#allocation2 + $0xe8] sm:$0xff] }
0x1713   :  { %2181 = vrot.lane.b32.xlu1 %v4566_v50, %s3924_s28 }
0x178b   :  { %v2170_v37 = vpop.xlane.xlu1 %2169 }
0x178c   :  { %v2171_v29 = vsub.f32 %v2165_v16, %v2170_v37  ;;  %v3894_v37 = vld [vmem:[#allocation2 + $0xd0] sm:$0xff] }
0x178e   :  { %v2172_v33 = vmul.f32 1.442695, %v2171_v29 }
0x178f   :  { %v2182_v54 = vpop.permute.xlu1 %2181 }
0x1790   :  { %3839 = vpow2.f32 %v2172_v33 }
0x1791   :  { %3841 = vtanh.f32 %v4500_v63 }
0x179d   :  { %v3840_v11 = vpop.eup %3839 }
0x179e   :  { %v2174_v34 = vsel %vm294_vm2, %v3840_v11, 0.0  ;;  %v3842_v36 = vpop.eup %3841 }
0x179f   :  { %2175 = vadd.xlane.f32.xlu0 %v2174_v34 }
0x17b5   :  { %2012 = vrot.lane.b32.xlu0 %v3842_v36, %s3924_s28 }
0x1828   :  { %v2176_v44 = vpop.xlane.xlu0 %2175 }
0x1829   :  { %3843 = vrcp.f32 %v2176_v44 }
0x182c   :  { %v2013_v4 = vpop.permute.xlu0 %2012 }
0x182d   :  { %v2015_v45 = vmul.f32 %v2013_v4, %v4493_v55 }
0x182f   :  { %2349 = vrot.lane.b32.xlu1 %v2015_v45, %s3925_s29 }
0x1836   :  { %v3844_v9 = vpop.eup %3843 }
0x1837   :  { %v2178_v49 = vmul.f32 %v3844_v9, %v3840_v11 }
0x1839   :  { %v2179_v52 = vmul.f32 %v2178_v49, %v4504_v6 }
0x183b   :  { %v2184_v14 = vsel %vm294_vm2, %v2179_v52, %v2182_v54 }
0x183c   :  { %3651 = vmatmul.mubr.msk.f32.vlgmr.msra.gmra.mxu1 %vm464_vm4, %v2184_v14 }
0x183d   :  { %3678 = vmatpush3.msra.mxu1 %v4432_v17  ;;  %3689 = vmatprep.mubr.msk.f32.mxu1 %vm3921_vm0, %v3920_v0 }
0x183e   :  { %3679 = vmatprep.subr.mxu1 %v3920_v0 }
0x183f   :  { %3680 = vmatpush3.msra.mxu1 %v4438_v21  ;;  %v4592_v21 = vld [vmem:[#allocation2 + $0xc8] ss:$0 sm:$0xff] }
0x1840   :  { %3681 = vmatprep.subr.mxu1 %v3920_v0 }
0x1841   :  { %3682 = vmatpush3.msra.mxu1 %v4442_v3 }
0x1842   :  { %3683 = vmatprep.subr.mxu1 %v3920_v0 }
0x1843   :  { %3684 = vmatpush3.msra.mxu1 %v4446_v5 }
0x1844   :  { %3685 = vmatprep.subr.mxu1 %v3920_v0 }
0x1845   :  { %3686 = vmatpush3.msra.mxu1 %v4450_v7 }
0x1846   :  { %3687 = vmatprep.subr.mxu1 %v3920_v0 }
0x1847   :  { %3688 = vmatpush3.msra.mxu1 %v4454_v23 }
0x1848   :  { %3718 = vmatprep.subr.mxu1 %v3920_v0 }
0x18a1   :  { %v2350_v5 = vpop.permute.xlu1 %2349 }
0x18fc   :  { %v2254_v17 = vpop.f32.mrf.mxu1 }
0x18fd   :  { %v2255_v55 = vadd.f32 %v4592_v21, %v2254_v17 }
0x18fe   :  { %v3652_v3 = vpop.f32.mrf.mxu1 }
0x18ff   :  { %v2258_v42 = vmax.f32 %v2255_v55, 0.0 }
0x1901   :  { %3666 = vmatmul.mubr.msk.f32.vlgmr.msra.gmra.mxu0 %vm294_vm2, %v2258_v42 }
0x1902   :  { %3669 = vmatpush3.msra.mxu0 %v4460_v15  ;;  %3674 = vmatprep.mubr.msk.f32.mxu0 %vm3921_vm0, %v3920_v0  ;;  %v191_v15 = vadd.f32 %v4485_v39, %v4046_v41 }
0x1903   :  { %3670 = vmatprep.subr.mxu0 %v3920_v0 }
0x1904   :  { %3671 = vmatpush3.msra.mxu0 %v4466_v30 }
0x1905   :  { %3672 = vmatprep.subr.mxu0 %v3920_v0 }
0x1906   :  { %3673 = vmatpush3.msra.mxu0 %v4470_v38 }
0x1907   :  { %3675 = vmatmul.mubr.msk.f32.vlgmr.msra.gmra.mxu0 %vm80_vm1, %v2350_v5  ;;  %3692 = vmatprep.subr.mxu0 %v3920_v0 }
0x1908   :  { %3693 = vmatpush3.msra.mxu0 %v4475_v31  ;;  %3696 = vmatprep.mubr.msk.f32.mxu0 %vm3921_vm0, %v3920_v0 }
0x1909   :  { %3694 = vmatprep.subr.mxu0 %v3920_v0 }
0x190a   :  { %3695 = vmatpush3.msra.mxu0 %v4481_v32  ;;  %v4616_v32 = vld [vmem:[#allocation2 + $0x100] ss:$0 sm:$0xff] }
0x190b   :  { %3699 = vmatprep.subr.mxu0 %v3920_v0 }
0x19c1   :  { %v2328_v7 = vpop.f32.mrf.mxu0 }
0x19c2   :  { %v2329_v58 = vadd.f32 %v4616_v32, %v2328_v7  ;;  %v60_v7 = vld [vmem:[#allocation2 + $0x118] sm:$0xff] }
0x19c3   :  { %v3667_v23 = vpop.f32.mrf.mxu0 }
0x19c4   :  { %v2332_v1 = vmul.f32 0.5, %v2329_v58  ;;  %v59_v23 = vld [vmem:[#allocation2 + $0x110] sm:$0xff] }
0x19c7   :  { %v2419_v30 = vpop.f32.mrf.mxu0 }
0x19c8   :  { %v2420_v38 = vadd.f32 %v2419_v30, %v191_v15  ;;  %v58_v15 = vld [vmem:[#allocation2 + $0x108] sm:$0xff] }
0x19c9   :  { %v3676_v56 = vpop.f32.mrf.mxu0 }
0x19ca   :  { %3845 = vtanh.f32 %v2420_v38  ;;  %v2423_v31 = vmul.f32 0.5, %v2420_v38 }
0x19cc   :  { %3847 = vtanh.f32 %v2423_v31  ;;  %v3121_v31 = vld [vmem:[#allocation2 + $0x120] ss:$0 sm:$0xff] }
0x19cd   :  { %3849 = vtanh.f32 %v2329_v58 }
0x19ce   :  { %3851 = vtanh.f32 %v2332_v1 }
0x19d7   :  { %v3846_v57 = vpop.eup %3845 }
0x19d8   :  { %2430 = vrot.lane.b32.xlu1 %v3846_v57, %s3922_s0 }
0x19d9   :  { %v3848_v43 = vpop.eup %3847 }
0x19da   :  { %v2425_v61 = vadd.f32 1.0, %v3848_v43  ;;  %v3850_v62 = vpop.eup %3849 }
0x19db   :  { %v3852_v2 = vpop.eup %3851 }
0x19dc   :  { %2446 = vrot.lane.b32.xlu1 %v4500_v63, %s3926_s30  ;;  %v4619_v41 = vmul.f32 0.5, %v2425_v61  ;;  %v2334_v59 = vadd.f32 1.0, %v3852_v2 }
0x19de   :  { %v2428_v6 = vmul.f32 %v4619_v41, %v4500_v63  ;;  %v2335_v51 = vmul.f32 0.5, %v2334_v59  ;;  %v3890_v63 = vld [vmem:[#allocation2 + $0xf0] sm:$0xff] }
0x1a4a   :  { %v2431_v39 = vpop.permute.xlu1 %2430 }
0x1a4b   :  { %v2433_v53 = vmul.f32 %v2431_v39, %v4619_v41 }
0x1a4d   :  { %2435 = vrot.lane.b32.xlu0 %v2433_v53, %s3923_s27 }
0x1a4e   :  { %v2447_v40 = vpop.permute.xlu1 %2446 }
0x1a51   :  { %2339 = vrot.lane.b32.xlu0 %v3850_v62, %s3927_s3 }
0x1abf   :  { %v2436_v8 = vpop.permute.xlu0 %2435 }
0x1ac0   :  { %v4626_v10 = vadd.f32 %v2436_v8, %v2428_v6 }
0x1ac2   :  { %v4630_v13 = vsel %vm80_vm1, %v2447_v40, %v4626_v10 }
0x1ac3   :  { %v2340_v20 = vpop.permute.xlu0 %2339  ;;  %3690 = vmatmul.mubr.msk.f32.vlgmr.msra.gmra.mxu1 %vm294_vm2, %v4630_v13 }
0x1ac4   :  { %v2342_v16 = vmul.f32 %v2340_v20, %v2335_v51  ;;  %3719 = vmatpush3.msra.mxu1 %v3889_v19  ;;  %3730 = vmatprep.mubr.msk.f32.mxu1 %vm3921_vm0, %v3920_v0 }
0x1ac5   :  { %3720 = vmatprep.subr.mxu1 %v3920_v0 }
0x1ac6   :  { %2344 = vrot.lane.b32.xlu0 %v2342_v16, %s3927_s3  ;;  %3721 = vmatpush3.msra.mxu1 %v3890_v63 }
0x1ac7   :  { %3722 = vmatprep.subr.mxu1 %v3920_v0 }
0x1ac8   :  { %3723 = vmatpush3.msra.mxu1 %v3891_v47 }
0x1ac9   :  { %3724 = vmatprep.subr.mxu1 %v3920_v0 }
0x1aca   :  { %3725 = vmatpush3.msra.mxu1 %v3892_v24 }
0x1acb   :  { %3726 = vmatprep.subr.mxu1 %v3920_v0 }
0x1acc   :  { %3727 = vmatpush3.msra.mxu1 %v3893_v27 }
0x1acd   :  { %3728 = vmatprep.subr.mxu1 %v3920_v0 }
0x1ace   :  { %3729 = vmatpush3.msra.mxu1 %v3894_v37 }
0x1acf   :  { %3733 = vmatprep.subr.mxu1 %v3920_v0 }
0x1b83   :  { %v2519_v29 = vpop.f32.mrf.mxu1 }
0x1b84   :  { %v2520_v33 = vadd.f32 %v4523_v12, %v2519_v29 }
0x1b85   :  { %v3691_v11 = vpop.f32.mrf.mxu1 }
0x1b86   :  { %v2523_v34 = vmax.f32 %v2520_v33, 0.0 }
0x1b88   :  { %3697 = vmatmul.mubr.msk.f32.vlgmr.msra.gmra.mxu0 %vm373_vm3, %v2523_v34 }
0x1b89   :  { %3700 = vmatpush3.msra.mxu0 %v4527_v25  ;;  %3715 = vmatprep.mubr.msk.f32.mxu0 %vm3921_vm0, %v3920_v0 }
0x1b8a   :  { %3701 = vmatprep.subr.mxu0 %v3920_v0 }
0x1b8b   :  { %3702 = vmatpush3.msra.mxu0 %v4533_v26 }
0x1b8c   :  { %3703 = vmatprep.subr.mxu0 %v3920_v0 }
0x1b8d   :  { %3704 = vmatpush3.msra.mxu0 %v4537_v28 }
0x1b8e   :  { %3705 = vmatprep.subr.mxu0 %v3920_v0 }
0x1b8f   :  { %3706 = vmatpush3.msra.mxu0 %v4541_v35  ;;  %v2345_v35 = vpop.permute.xlu0 %2344 }
0x1b90   :  { %3707 = vmatprep.subr.mxu0 %v3920_v0 }
0x1b91   :  { %3708 = vmatpush3.msra.mxu0 %v4545_v48  ;;  %v2337_v48 = vmul.f32 %v2335_v51, %v4566_v50 }
0x1b92   :  { %3709 = vmatprep.subr.mxu0 %v3920_v0 }
0x1b93   :  { %3710 = vmatpush3.msra.mxu0 %v4549_v60  ;;  %v4666_v60 = vadd.f32 %v2345_v35, %v2337_v48 }
0x1b94   :  { %3711 = vmatprep.subr.mxu0 %v3920_v0 }
0x1b95   :  { %3712 = vmatpush3.msra.mxu0 %v4553_v46 }
0x1b96   :  { %3713 = vmatprep.subr.mxu0 %v3920_v0 }
0x1b97   :  { %3714 = vmatpush3.msra.mxu0 %v4557_v18 }
0x1b98   :  { %3742 = vmatprep.subr.mxu0 %v3920_v0 }
0x1c48   :  { %v2593_v12 = vpop.f32.mrf.mxu0 }
0x1c49   :  { %v2594_v25 = vadd.f32 %v4561_v22, %v2593_v12 }
0x1c4a   :  { %v3698_v26 = vpop.f32.mrf.mxu0 }
0x1c4b   :  { %v2597_v28 = vsel %vm294_vm2, %v2594_v25, -inf }
0x1c4c   :  { %2598 = vmax.xlane.f32.xlu1 %v2597_v28 }
0x1c5d   :  { %2610 = vrot.lane.b32.xlu1 %v4666_v60, %s3924_s28 }
0x1cd5   :  { %v2599_v46 = vpop.xlane.xlu1 %2598 }
0x1cd6   :  { %v2600_v36 = vsub.f32 %v2594_v25, %v2599_v46 }
0x1cd8   :  { %v2601_v18 = vmul.f32 1.442695, %v2600_v36 }
0x1cd9   :  { %v2611_v14 = vpop.permute.xlu1 %2610 }
0x1cda   :  { %3853 = vpow2.f32 %v2601_v18 }
0x1cdb   :  { %3855 = vtanh.f32 %v4626_v10 }
0x1ce7   :  { %v3854_v44 = vpop.eup %3853 }
0x1ce8   :  { %v2603_v4 = vsel %vm294_vm2, %v3854_v44, 0.0  ;;  %v3856_v22 = vpop.eup %3855 }
0x1ce9   :  { %2604 = vadd.xlane.f32.xlu0 %v2603_v4 }
0x1cff   :  { %2441 = vrot.lane.b32.xlu0 %v3856_v22, %s3924_s28 }
0x1d72   :  { %v2605_v45 = vpop.xlane.xlu0 %2604 }
0x1d73   :  { %3857 = vrcp.f32 %v2605_v45 }
0x1d76   :  { %v2442_v50 = vpop.permute.xlu0 %2441 }
0x1d77   :  { %v2444_v9 = vmul.f32 %v2442_v50, %v4619_v41 }
0x1d79   :  { %2782 = vrot.lane.b32.xlu1 %v2444_v9, %s3925_s29 }
0x1d80   :  { %v3858_v49 = vpop.eup %3857 }
0x1d81   :  { %v2607_v52 = vmul.f32 %v3858_v49, %v3854_v44 }
0x1d83   :  { %v2608_v54 = vmul.f32 %v2607_v52, %v4630_v13 }
0x1d85   :  { %v2613_v17 = vsel %vm294_vm2, %v2608_v54, %v2611_v14  ;;  %v65_v54 = vld [vmem:[#allocation2 + $0x140] sm:$0xff]  ;;  %v64_v14 = vld [vmem:[#allocation2 + $0x138] sm:$0xff] }
0x1d86   :  { %3716 = vmatmul.mubr.msk.f32.vlgmr.msra.gmra.mxu0 %vm464_vm4, %v2613_v17  ;;  %v63_v17 = vld [vmem:[#allocation2 + $0x130] sm:$0xff] }
0x1d87   :  { %3750 = vmatprep.mubr.msk.f32.mxu0 %vm3921_vm0, %v3920_v0  ;;  %3743 = vmatpush3.msra.mxu0 %v65_v54 }
0x1d88   :  { %3744 = vmatprep.subr.mxu0 %v3920_v0 }
0x1d89   :  { %3745 = vmatpush3.msra.mxu0 %v64_v14 }
0x1d8a   :  { %3746 = vmatprep.subr.mxu0 %v3920_v0 }
0x1d8b   :  { %3747 = vmatpush3.msra.mxu0 %v63_v17 }
0x1d8c   :  { %3748 = vmatprep.subr.mxu0 %v3920_v0 }
0x1deb   :  { %v2783_v30 = vpop.permute.xlu1 %2782 }
0x1e46   :  { %v2683_v55 = vpop.f32.mrf.mxu0 }
0x1e47   :  { %v2684_v3 = vadd.f32 %v4592_v21, %v2683_v55  ;;  %v2856_v21 = vlaneseq }
0x1e48   :  { %v3717_v42 = vpop.f32.mrf.mxu0 }
0x1e49   :  { %v2687_v5 = vmax.f32 %v2684_v3, 0.0  ;;  %v2857_v57 = vshrl.u32 %v2856_v21, 7  ;;  %v62_v42 = vld [vmem:[#allocation2 + $0x128] sm:$0xff] }
0x1e4a   :  { %3749 = vmatpush3.msra.mxu0 %v62_v42 }
0x1e4b   :  { %3731 = vmatmul.mubr.msk.f32.vlgmr.msra.gmra.mxu1 %vm294_vm2, %v2687_v5  ;;  %vm2858_vm5 = vcmp.lt.s32.totalorder %v2857_v57, 4 }
0x1e4c   :  { %3734 = vmatpush3.msra.mxu1 %v60_v7  ;;  %3739 = vmatprep.mubr.msk.f32.mxu1 %vm3921_vm0, %v3920_v0 }
0x1e4d   :  { %3735 = vmatprep.subr.mxu1 %v3920_v0 }
0x1e4e   :  { %3736 = vmatpush3.msra.mxu1 %v59_v23 }
0x1e4f   :  { %3737 = vmatprep.subr.mxu1 %v3920_v0 }
0x1e50   :  { %3738 = vmatpush3.msra.mxu1 %v58_v15 }
0x1e51   :  { %3740 = vmatmul.mubr.msk.f32.vlgmr.msra.gmra.mxu1 %vm80_vm1, %v2783_v30  ;;  %3753 = vmatprep.subr.mxu1 %v3920_v0 }
0x1e52   :  { %3757 = vmatprep.mubr.msk.f32.mxu1 %vm3921_vm0, %v3920_v0 }
0x1f0b   :  { %v2757_v38 = vpop.f32.mrf.mxu1 }
0x1f0c   :  { %v2758_v39 = vadd.f32 %v4616_v32, %v2757_v38 }
0x1f0d   :  { %v3732_v56 = vpop.f32.mrf.mxu1 }
0x1f0e   :  { %3859 = vtanh.f32 %v2758_v39  ;;  %v2761_v6 = vmul.f32 0.5, %v2758_v39 }
0x1f10   :  { %3861 = vtanh.f32 %v2761_v6 }
0x1f11   :  { %v2852_v58 = vpop.f32.mrf.mxu1 }
0x1f12   :  { %v2853_v43 = vadd.f32 %v3121_v31, %v2852_v58  ;;  %v68_v31 = vld [vmem:[#allocation2 + $0x158] sm:$0xff]  ;;  %v67_v58 = vld [vmem:[#allocation2 + $0x150] sm:$0xff] }
0x1f13   :  { %v3741_v61 = vpop.f32.mrf.mxu1  ;;  %3754 = vmatpush3.msra.mxu1 %v68_v31 }
0x1f14   :  { %v2859_v41 = vsel %vm2858_vm5, %v2853_v43, -inf  ;;  %3755 = vmatprep.subr.mxu1 %v3920_v0 }
0x1f15   :  { %v2871_v53 = vsel %vm2870_vm6, %v2859_v41, -inf  ;;  %v2860_v62 = vsel %vm373_vm3, %v2859_v41, -inf  ;;  %v2882_v1 = vsel %vm2881_vm7, %v2859_v41, -inf  ;;  %3756 = vmatpush3.msra.mxu1 %v67_v58 }
0x1f16   :  { %2872 = vmax.xlane.f32.xlu0 %v2871_v53  ;;  %2861 = vmax.xlane.f32.xlu1 %v2860_v62  ;;  %v3125_v53 = vld [vmem:[#allocation2 + $0x160] ss:$0 sm:$0xff] }
0x1f1a   :  { %2883 = vmax.xlane.f32.xlu0 %v2882_v1 }
0x1f1b   :  { %v3860_v2 = vpop.eup %3859 }
0x1f1d   :  { %v3862_v59 = vpop.eup %3861 }
0x1f1e   :  { %v2763_v8 = vadd.f32 1.0, %v3862_v59 }
0x1f20   :  { %v2764_v16 = vmul.f32 0.5, %v2763_v8 }
0x1f22   :  { %v2766_v5 = vmul.f32 %v2764_v16, %v4666_v60  ;;  %v3123_v60 = vld [vmem:[#allocation2 + $0x148] ss:$0 sm:$0xff] }
0x1f27   :  { %2768 = vrot.lane.b32.xlu1 %v3860_v2, %s3927_s3 }
0x1f9f   :  { %v2873_v10 = vpop.xlane.xlu0 %2872  ;;  %v2862_v40 = vpop.xlane.xlu1 %2861 }
0x1fa0   :  { %v2874_v13 = vrot.slane %v2873_v10, 4  ;;  %v2863_v32 = vrot.slane %v2862_v40, 4 }
0x1fa2   :  { %v2875_v51 = vmax.f32 %v2873_v10, %v2874_v13  ;;  %v2864_v20 = vmax.f32 %v2862_v40, %v2863_v32 }
0x1fa3   :  { %v2884_v19 = vpop.xlane.xlu0 %2883  ;;  %v2769_v63 = vpop.permute.xlu1 %2768 }
0x1fa4   :  { %v2876_v47 = vrot.slane %v2875_v51, 2  ;;  %v2865_v24 = vrot.slane %v2864_v20, 2  ;;  %v2885_v27 = vrot.slane %v2884_v19, 4  ;;  %v2771_v37 = vmul.f32 %v2769_v63, %v2764_v16 }
0x1fa6   :  { %v2886_v29 = vmax.f32 %v2884_v19, %v2885_v27  ;;  %2773 = vrot.lane.b32.xlu0 %v2771_v37, %s3927_s3  ;;  %v2866_v33 = vmax.f32 %v2864_v20, %v2865_v24  ;;  %v2877_v11 = vmax.f32 %v2875_v51, %v2876_v47 }
0x1fa8   :  { %v2887_v34 = vrot.slane %v2886_v29, 2  ;;  %v2867_v12 = vrot.slane %v2866_v33, 1  ;;  %v2878_v25 = vrot.slane %v2877_v11, 1 }
0x1faa   :  { %v2868_v26 = vmax.f32 %v2866_v33, %v2867_v12  ;;  %v2879_v28 = vmax.f32 %v2877_v11, %v2878_v25  ;;  %v2888_v35 = vmax.f32 %v2886_v29, %v2887_v34 }
0x1fac   :  { %3760 = vpush %v2868_v26  ;;  %v2889_v48 = vrot.slane %v2888_v35, 1 }
0x1fad   :  { %3762 = vpush %v2879_v28 }
0x1fae   :  { %v2890_v46 = vmax.f32 %v2888_v35, %v2889_v48 }
0x1fb0   :  { %3764 = vpush %v2890_v46 }
0x1fdd   :  { %s3761_s4 = spop %3760 }
0x1fde   :  { %v2892_v36 = vstv %s3761_s4  ;;  %s3763_s5 = spop %3762 }
0x1fdf   :  { %v2894_v18 = vstv %s3763_s5  ;;  %v2893_v44 = vsub.f32 %v2853_v43, %v2892_v36 }
0x1fe0   :  { %v2895_v4 = vsub.f32 %v2853_v43, %v2894_v18 }
0x1fe1   :  { %s3765_s6 = spop %3764 }
0x1fe2   :  { %v2896_v22 = vstv %s3765_s6  ;;  %v2898_v50 = vsel %vm373_vm3, %v2893_v44, %v2895_v4 }
0x1fe3   :  { %v2897_v45 = vsub.f32 %v2853_v43, %v2896_v22 }
0x1fe5   :  { %v2900_v9 = vsel %vm2899_vm8, %v2898_v50, %v2897_v45 }
0x1fe6   :  { %v2901_v49 = vmul.f32 0.5, %v2900_v9 }
0x1fe8   :  { %v2902_v52 = vmul.f32 1.442695, %v2901_v49 }
0x1fea   :  { %3863 = vpow2.f32 %v2902_v52 }
0x1ff7   :  { %v3864_v55 = vpop.eup %3863 }
0x1ff8   :  { %v2904_v3 = vmul.f32 %v3864_v55, %v2900_v9 }
0x1ffa   :  { %2906 = vrot.lane.b32.xlu1 %v2904_v3, %s3927_s3 }
0x1ffe   :  { %2910 = vrot.lane.b32.xlu1 %v2904_v3, %s3928_s7 }
0x2018   :  { %v2774_v7 = vpop.permute.xlu0 %2773 }
0x2019   :  { %v2776_v23 = vadd.f32 %v2774_v7, %v2766_v5 }
0x201b   :  { %2915 = vrot.lane.b32.xlu0 %v2776_v23, %s3929_s8 }
0x206c   :  { %v2907_v15 = vpop.permute.xlu1 %2906 }
0x206d   :  { %v2909_v21 = vadd.f32 %v2907_v15, %v2904_v3 }
0x2070   :  { %v2911_v30 = vpop.permute.xlu1 %2910 }
0x2071   :  { %v2913_v38 = vadd.f32 %v2911_v30, %v2909_v21 }
0x208d   :  { %v2916_v56 = vpop.permute.xlu0 %2915 }
0x208e   :  { %v2918_v57 = vsel %vm373_vm3, %v2913_v38, %v2916_v56 }
0x208f   :  { %3751 = vmatmul.mubr.msk.f32.vlgmr.msra.gmra.mxu0 %vm2899_vm8, %v2918_v57 }
0x214f   :  { %v2992_v43 = vpop.f32.mrf.mxu0 }
0x2150   :  { %v2993_v61 = vadd.f32 %v3123_v60, %v2992_v43 }
0x2151   :  { %v3752_v41 = vpop.f32.mrf.mxu0 }
0x2152   :  { %v2996_v39 = vmax.f32 %v2993_v61, 0.0 }
0x2154   :  { %3758 = vmatmul.mubr.msk.f32.vlgmr.msra.gmra.mxu1 %vm373_vm3, %v2996_v39 }
0x2214   :  { %v3070_v62 = vpop.f32.mrf.mxu1 }
0x2215   :  { %v3071_v1 = vadd.f32 %v3125_v53, %v3070_v62 }
0x2216   :  { %v3759_v2 = vpop.f32.mrf.mxu1 }
0x2217   :  { %3075 = vst.msk [vmem:[%s4710_s2] sm:$0xff] %vm3074_vm9, %v3071_v1 }
0x2218   :  { %3080 = vsyncpa [#allocation3], 1 }

</bundles_post_ra>
